<compile_context>
chip_gen: v7x
topology: tpu7x:2x2x1
jax: 0.10.0
libtpu: 0.0.40
codegen_flags: <defaults>
</compile_context>

<pallas_src>
import functools

import jax
import jax.numpy as jnp
from jax.experimental import pallas as pl
from jax.experimental.pallas import tpu as pltpu

_SELU_ALPHA = 1.6732632423543772848170429916717
_SELU_SCALE = 1.0507009873554804934193349852946
_BN_EPS = 1e-5

_VMEM_LIMIT_CACHE = [None]


def _vmem_limit_bytes():
    """Per-generation VMEM limit: half of physical, clamped to [32, 96] MiB."""
    if _VMEM_LIMIT_CACHE[0] is None:
        cap = 64 * 1024 * 1024
        try:
            cap = int(pltpu.get_tpu_info().vmem_capacity_bytes)
        except Exception:       # pragma: no cover - fall back to a safe default
            pass
        _VMEM_LIMIT_CACHE[0] = int(min(max(cap // 2, 32 * 1024 * 1024),
                                       96 * 1024 * 1024))
    return _VMEM_LIMIT_CACHE[0]


def _compiler_params(semantics):
    return pltpu.CompilerParams(dimension_semantics=semantics,
                                vmem_limit_bytes=_vmem_limit_bytes())


def _rep2(shape):
    """Full-array block, resident across a rank-2 grid."""
    zeros = (0,) * len(shape)
    return pl.BlockSpec(shape, lambda p, b: zeros)


def _rep1(shape):
    """Full-array block, resident across a rank-1 grid."""
    zeros = (0,) * len(shape)
    return pl.BlockSpec(shape, lambda b: zeros)


# ---------------------------------------------------------------------------
# In-kernel math helpers.
# ---------------------------------------------------------------------------

def _make_edge_masks(S, W):
    """Validity masks (1, S) for the 8 shifted taps of a 3x3 'same' conv."""
    pos = jax.lax.broadcasted_iota(jnp.int32, (1, S), 1)
    if W & (W - 1) == 0:
        w_idx = jnp.bitwise_and(pos, W - 1)          # pos % W via bit-trick
    else:
        w_idx = pos % W  # TODO(synk): non-power-of-2 W uses vector integer remainder.
    masks = {}
    for dy in (-1, 0, 1):
        for dx in (-1, 0, 1):
            conds = []
            if dy < 0:
                conds.append(pos >= (-dy) * W)        # h + dy >= 0
            if dy > 0:
                conds.append(pos < S - dy * W)        # h + dy < H
            if dx < 0:
                conds.append(w_idx >= -dx)            # w + dx >= 0
            if dx > 0:
                conds.append(w_idx < W - dx)          # w + dx < W
            masks[(dy, dx)] = (functools.reduce(jnp.logical_and, conds)
                               if conds else None)
    return masks


def _conv3x3_im2col(x, masks, patches_ref, w_ref, W, S):
    """3x3 'same' conv on one image, no bias (absorbed by training-mode BN).

    x           : (Cin, S) f32, S = H*W flattened spatial on the lane axis.
    patches_ref : (9*Cin, S) bf16 VMEM scratch (im2col slab), cast at store time.
    w_ref       : (Cout, 9*Cin) bf16, row k = (kh*3 + kw)*Cin + c.
    returns     : (Cout, S) f32 conv result (single K = 9*Cin MXU matmul).
    """
    Cin = x.shape[0]
    for dy in (-1, 0, 1):
        for dx in (-1, 0, 1):
            t = (dy + 1) * 3 + (dx + 1)
            d = dy * W + dx                           # source offset in flat spatial
            # out[s] needs in[s + d]; pltpu.roll matches jnp.roll -> shift by -d (XLU).
            tap = x if d == 0 else pltpu.roll(x, shift=(-d) % S, axis=1)
            m = masks[(dy, dx)]
            if m is not None:
                tap = jnp.where(m, tap, 0.0)
            patches_ref[t * Cin:(t + 1) * Cin, :] = tap.astype(jnp.bfloat16)
    return jnp.dot(w_ref[...], patches_ref[...], preferred_element_type=jnp.float32)


def _bn_scale_shift(s_sum, s_sq, gamma, beta, count):
    """Fold BN (batch stats) into per-channel scale/shift: z = y*scale + shift."""
    inv_n = 1.0 / count
    mean = s_sum * inv_n
    var = jnp.maximum(s_sq * inv_n - mean * mean, 0.0)   # biased batch variance
    scale = gamma * jax.lax.rsqrt(var + _BN_EPS)
    shift = beta - scale * mean
    return scale, shift


def _selu(z):
    neg = _SELU_ALPHA * (jnp.exp(jnp.minimum(z, 0.0)) - 1.0)   # clamp avoids inf exp
    return _SELU_SCALE * jnp.where(z > 0, z, neg)


def _init_stats(sum_ref, sq_ref):
    @pl.when(pl.program_id(1) == 0)
    def _():
        sum_ref[...] = jnp.zeros_like(sum_ref)
        sq_ref[...] = jnp.zeros_like(sq_ref)


# ---------------------------------------------------------------------------
# Kernel bodies.
# ---------------------------------------------------------------------------

def _conv_stats_kernel(x_ref, w_ref, y_ref, sum_ref, sq_ref, patches_ref,
                       *, H, W, n_img):
    S = H * W
    _init_stats(sum_ref, sq_ref)
    masks = _make_edge_masks(S, W)
    for i in range(n_img):                                    # static unroll, B_TILE imgs
        acc = _conv3x3_im2col(x_ref[i].astype(jnp.float32), masks,
                              patches_ref, w_ref, W, S)       # (Cout, S) f32
        y_ref[i] = acc.astype(y_ref.dtype)                    # bf16 HBM intermediate
        sum_ref[...] += jnp.sum(acc, axis=1, keepdims=True)   # stats from f32 acc
        sq_ref[...] += jnp.sum(acc * acc, axis=1, keepdims=True)


def _bn_selu_conv_stats_kernel(y_ref, s_ref, q_ref, g_ref, be_ref, w_ref,
                               y2_ref, sum_ref, sq_ref, patches_ref,
                               *, H, W, count, n_img):
    S = H * W
    _init_stats(sum_ref, sq_ref)
    scale, shift = _bn_scale_shift(s_ref[...], q_ref[...], g_ref[...], be_ref[...],
                                   count)
    masks = _make_edge_masks(S, W)
    for i in range(n_img):
        h = _selu(y_ref[i] * scale + shift)                   # f32 (Cmid, S)
        acc = _conv3x3_im2col(h, masks, patches_ref, w_ref, W, S)
        y2_ref[i] = acc.astype(y2_ref.dtype)
        sum_ref[...] += jnp.sum(acc, axis=1, keepdims=True)
        sq_ref[...] += jnp.sum(acc * acc, axis=1, keepdims=True)


def _bn_selu_kernel(y_ref, s_ref, q_ref, g_ref, be_ref, o_ref, *, count, n_img):
    scale, shift = _bn_scale_shift(s_ref[...], q_ref[...], g_ref[...], be_ref[...],
                                   count)
    for i in range(n_img):
        o_ref[i] = _selu(y_ref[i] * scale + shift).astype(o_ref.dtype)


# ---------------------------------------------------------------------------
# pallas_call wrappers.
# ---------------------------------------------------------------------------

def _conv_stats_call(x, w2d, H, W, b_tile, nc):
    B, Cin, S = x.shape
    Cout = w2d.shape[0]
    n_inner = (B // b_tile) // nc
    return pl.pallas_call(
        functools.partial(_conv_stats_kernel, H=H, W=W, n_img=b_tile),
        grid=(nc, n_inner),
        in_specs=[
            pl.BlockSpec((b_tile, Cin, S), lambda p, b: (p * n_inner + b, 0, 0)),
            _rep2(w2d.shape),
        ],
        out_specs=[
            pl.BlockSpec((b_tile, Cout, S), lambda p, b: (p * n_inner + b, 0, 0)),
            pl.BlockSpec((None, Cout, 1), lambda p, b: (p, 0, 0)),
            pl.BlockSpec((None, Cout, 1), lambda p, b: (p, 0, 0)),
        ],
        out_shape=[
            jax.ShapeDtypeStruct((B, Cout, S), jnp.bfloat16),
            jax.ShapeDtypeStruct((nc, Cout, 1), jnp.float32),
            jax.ShapeDtypeStruct((nc, Cout, 1), jnp.float32),
        ],
        scratch_shapes=[pltpu.VMEM((9 * Cin, S), jnp.bfloat16)],
        compiler_params=_compiler_params(("parallel", "arbitrary")),
    )(x, w2d)


def _bn_selu_conv_stats_call(y, s_sum, s_sq, gamma, beta, w2d, H, W, count,
                             b_tile, nc):
    B, Cmid, S = y.shape
    Cout = w2d.shape[0]
    n_inner = (B // b_tile) // nc
    return pl.pallas_call(
        functools.partial(_bn_selu_conv_stats_kernel, H=H, W=W, count=count,
                          n_img=b_tile),
        grid=(nc, n_inner),
        in_specs=[
            pl.BlockSpec((b_tile, Cmid, S), lambda p, b: (p * n_inner + b, 0, 0)),
            _rep2((Cmid, 1)), _rep2((Cmid, 1)), _rep2((Cmid, 1)), _rep2((Cmid, 1)),
            _rep2(w2d.shape),
        ],
        out_specs=[
            pl.BlockSpec((b_tile, Cout, S), lambda p, b: (p * n_inner + b, 0, 0)),
            pl.BlockSpec((None, Cout, 1), lambda p, b: (p, 0, 0)),
            pl.BlockSpec((None, Cout, 1), lambda p, b: (p, 0, 0)),
        ],
        out_shape=[
            jax.ShapeDtypeStruct((B, Cout, S), jnp.bfloat16),
            jax.ShapeDtypeStruct((nc, Cout, 1), jnp.float32),
            jax.ShapeDtypeStruct((nc, Cout, 1), jnp.float32),
        ],
        scratch_shapes=[pltpu.VMEM((9 * Cmid, S), jnp.bfloat16)],
        compiler_params=_compiler_params(("parallel", "arbitrary")),
    )(y, s_sum, s_sq, gamma, beta, w2d)


def _bn_selu_call(y, s_sum, s_sq, gamma, beta, count, b_tile):
    B, C, S = y.shape
    n_steps = B // b_tile
    return pl.pallas_call(
        functools.partial(_bn_selu_kernel, count=count, n_img=b_tile),
        grid=(n_steps,),
        in_specs=[
            pl.BlockSpec((b_tile, C, S), lambda b: (b, 0, 0)),
            _rep1((C, 1)), _rep1((C, 1)), _rep1((C, 1)), _rep1((C, 1)),
        ],
        out_specs=pl.BlockSpec((b_tile, C, S), lambda b: (b, 0, 0)),
        out_shape=jax.ShapeDtypeStruct((B, C, S), jnp.float32),
        compiler_params=_compiler_params(("parallel",)),      # pure elementwise pass
    )(y, s_sum, s_sq, gamma, beta)


# ---------------------------------------------------------------------------
# Tiling heuristics, parameters & forward.
# ---------------------------------------------------------------------------

def _choose_tiling(B, Cin, Cmid, Cout, S):
    """Pick (B_TILE, NC): biggest batch tile that fits the VMEM budget, then split
    the remaining grid steps over 2 'parallel' cores when the step count is even."""
    budget = int(_vmem_limit_bytes() * 0.6)
    per_img = max((Cin + Cmid) * 2 * S,          # call A: bf16 in + bf16 out
                  (Cmid + Cout) * 2 * S,         # call B
                  (Cout * 2 + Cout * 4) * S)     # call C: bf16 in + f32 out
    slab = 9 * max(Cin, Cmid) * S * 2            # bf16 im2col scratch (single buffer)
    b_tile = 1
    for t in range(1, B + 1):
        if B % t == 0 and slab + 2 * t * per_img <= budget:   # x2 for double-buffering
            b_tile = t
    n_steps = B // b_tile
    nc = 2 if n_steps % 2 == 0 else 1
    return b_tile, nc


def _pack_conv_weight(w_oihw):
    """(Cout, Cin, 3, 3) OIHW -> (Cout, 9*Cin) bf16 with row k = (kh*3 + kw)*Cin + c."""
    Cout, Cin, KH, KW = w_oihw.shape
    return (jnp.transpose(w_oihw, (0, 2, 3, 1))
            .reshape(Cout, KH * KW * Cin).astype(jnp.bfloat16))


def init_vgg_block_params(key, in_channels, middle_channels, out_channels):
    """Shapes/init follow nn.Conv2d (OIHW) and nn.BatchNorm2d defaults."""
    k1, k2, k3, k4 = jax.random.split(key, 4)
    bound1 = 1.0 / (in_channels * 9) ** 0.5
    bound2 = 1.0 / (middle_channels * 9) ** 0.5
    return {
        "w1": jax.random.uniform(k1, (middle_channels, in_channels, 3, 3),
                                 jnp.float32, -bound1, bound1),
        "b1": jax.random.uniform(k2, (middle_channels,), jnp.float32, -bound1, bound1),
        "w2": jax.random.uniform(k3, (out_channels, middle_channels, 3, 3),
                                 jnp.float32, -bound2, bound2),
        "b2": jax.random.uniform(k4, (out_channels,), jnp.float32, -bound2, bound2),
        "gamma1": jnp.ones((middle_channels,), jnp.float32),
        "beta1": jnp.zeros((middle_channels,), jnp.float32),
        "gamma2": jnp.ones((out_channels,), jnp.float32),
        "beta2": jnp.zeros((out_channels,), jnp.float32),
    }


def vgg_block_forward(x_nchw, params):
    """VGGBlock.forward; input/output are NCHW to match PyTorch.

    Note: conv biases (params['b1'], params['b2']) are NOT applied in-kernel because
    training-mode BatchNorm subtracts the batch mean, which absorbs a per-channel
    constant bias exactly (variance is unchanged), so the block output is identical.
    """
    B, Cin, H, W = x_nchw.shape
    S = H * W
    Cmid = params["gamma1"].shape[0]
    Cout = params["gamma2"].shape[0]
    count = float(B * S)                                   # BN reduces over (N, H, W)

    x = x_nchw.reshape(B, Cin, S).astype(jnp.bfloat16)     # free reshape, bf16 HBM read
    w1 = _pack_conv_weight(params["w1"])
    w2 = _pack_conv_weight(params["w2"])
    col = lambda v: v.reshape(-1, 1).astype(jnp.float32)

    b_tile, nc = _choose_tiling(B, Cin, Cmid, Cout, S)

    y1, s1, q1 = _conv_stats_call(x, w1, H, W, b_tile, nc)
    s1t, q1t = jnp.sum(s1, axis=0), jnp.sum(q1, axis=0)    # merge per-core partials
    y2, s2, q2 = _bn_selu_conv_stats_call(y1, s1t, q1t, col(params["gamma1"]),
                                          col(params["beta1"]), w2, H, W, count,
                                          b_tile, nc)
    s2t, q2t = jnp.sum(s2, axis=0), jnp.sum(q2, axis=0)
    out = _bn_selu_call(y2, s2t, q2t, col(params["gamma2"]), col(params["beta2"]),
                        count, b_tile)
    return out.reshape(B, Cout, H, W)


def _reference_forward(x, params):
    """Pure-JAX f32 reference matching the PyTorch module (training-mode BN)."""
    def layer(h, w, b, gamma, beta):
        y = jax.lax.conv_general_dilated(
            h, w, window_strides=(1, 1), padding="SAME",
            dimension_numbers=("NCHW", "OIHW", "NCHW"),
            precision=jax.lax.Precision.HIGHEST)
        y = y + b.reshape(1, -1, 1, 1)
        mean = jnp.mean(y, axis=(0, 2, 3), keepdims=True)
        var = jnp.mean((y - mean) ** 2, axis=(0, 2, 3), keepdims=True)
        z = (gamma.reshape(1, -1, 1, 1) * (y - mean) * jax.lax.rsqrt(var + _BN_EPS)
             + beta.reshape(1, -1, 1, 1))
        return jax.nn.selu(z)
    h = layer(x, params["w1"], params["b1"], params["gamma1"], params["beta1"])
    return layer(h, params["w2"], params["b2"], params["gamma2"], params["beta2"])


if __name__ == "__main__":
    key = jax.random.PRNGKey(0)
    kx, kp = jax.random.split(key)

    B, C_in, H, W = 2, 4, 16, 16
    C_mid, C_out = 8, 8

    x = jax.random.normal(kx, (B, C_in, H, W), jnp.float32)
    params = init_vgg_block_params(kp, C_in, C_mid, C_out)

    out = jax.block_until_ready(jax.jit(vgg_block_forward)(x, params))

    assert out.shape == (B, C_out, H, W), out.shape
    assert bool(jnp.all(jnp.isfinite(out)))

    ref = _reference_forward(x, params)
    max_err = float(jnp.max(jnp.abs(out - ref)))
    assert max_err < 0.1, f"max |pallas - reference| = {max_err}"

    print("KERNEL_OK")
</pallas_src>

<mosaic_0001>
module attributes {stable_mosaic.version = 11 : i64} {
  func.func @_bn_selu_kernel(%arg0: i32, %arg1: memref<2x8x256xbf16, #tpu.memory_space<vmem>>, %arg2: memref<8x1xf32, #tpu.memory_space<vmem>>, %arg3: memref<8x1xf32, #tpu.memory_space<vmem>>, %arg4: memref<8x1xf32, #tpu.memory_space<vmem>>, %arg5: memref<8x1xf32, #tpu.memory_space<vmem>>, %arg6: memref<2x8x256xf32, #tpu.memory_space<vmem>>) attributes {dimension_semantics = [#tpu.dimension_semantics<parallel>], iteration_bounds = array<i64: 1>, scalar_prefetch = 0 : i64, scratch_operands = 0 : i64, tpu.core_type = #tpu.core_type<tc>, window_params = [{transform_indices = @transform_0, window_bounds = array<i64: 2, 8, 256>}, {pipeline_mode = #tpu.pipeline_mode<synchronous>, transform_indices = @transform_1, window_bounds = array<i64: 8, 1>}, {pipeline_mode = #tpu.pipeline_mode<synchronous>, transform_indices = @transform_2, window_bounds = array<i64: 8, 1>}, {pipeline_mode = #tpu.pipeline_mode<synchronous>, transform_indices = @transform_3, window_bounds = array<i64: 8, 1>}, {pipeline_mode = #tpu.pipeline_mode<synchronous>, transform_indices = @transform_4, window_bounds = array<i64: 8, 1>}, {transform_indices = @transform_5, window_bounds = array<i64: 2, 8, 256>}]} {
    %c0 = arith.constant 0 : index
    %c0_0 = arith.constant 0 : index
    %0 = vector.load %arg2[%c0, %c0_0] : memref<8x1xf32, #tpu.memory_space<vmem>>, vector<8x1xf32>
    %c0_1 = arith.constant 0 : index
    %c0_2 = arith.constant 0 : index
    %1 = vector.load %arg3[%c0_1, %c0_2] : memref<8x1xf32, #tpu.memory_space<vmem>>, vector<8x1xf32>
    %c0_3 = arith.constant 0 : index
    %c0_4 = arith.constant 0 : index
    %2 = vector.load %arg4[%c0_3, %c0_4] : memref<8x1xf32, #tpu.memory_space<vmem>>, vector<8x1xf32>
    %c0_5 = arith.constant 0 : index
    %c0_6 = arith.constant 0 : index
    %3 = vector.load %arg5[%c0_5, %c0_6] : memref<8x1xf32, #tpu.memory_space<vmem>>, vector<8x1xf32>
    %cst = arith.constant 0.001953125 : f32
    %4 = vector.broadcast %cst : f32 to vector<8x1xf32>
    %5 = arith.mulf %0, %4 : vector<8x1xf32>
    %cst_7 = arith.constant 0.001953125 : f32
    %6 = vector.broadcast %cst_7 : f32 to vector<8x1xf32>
    %7 = arith.mulf %1, %6 : vector<8x1xf32>
    %8 = arith.mulf %5, %5 : vector<8x1xf32>
    %9 = arith.subf %7, %8 : vector<8x1xf32>
    %cst_8 = arith.constant 0.000000e+00 : f32
    %10 = vector.broadcast %cst_8 : f32 to vector<8x1xf32>
    %11 = arith.maximumf %9, %10 : vector<8x1xf32>
    %cst_9 = arith.constant 9.99999974E-6 : f32
    %12 = vector.broadcast %cst_9 : f32 to vector<8x1xf32>
    %13 = arith.addf %11, %12 : vector<8x1xf32>
    %14 = math.rsqrt %13 : vector<8x1xf32>
    %15 = arith.mulf %2, %14 : vector<8x1xf32>
    %16 = arith.mulf %15, %5 : vector<8x1xf32>
    %17 = arith.subf %3, %16 : vector<8x1xf32>
    %c0_10 = arith.constant 0 : index
    %c0_11 = arith.constant 0 : index
    %c0_12 = arith.constant 0 : index
    %18 = vector.load %arg1[%c0_10, %c0_11, %c0_12] : memref<2x8x256xbf16, #tpu.memory_space<vmem>>, vector<1x8x256xbf16>
    %19 = vector.shape_cast %18 : vector<1x8x256xbf16> to vector<8x256xbf16>
    %20 = arith.extf %19 : vector<8x256xbf16> to vector<8x256xf32>
    %21 = vector.broadcast %15 : vector<8x1xf32> to vector<8x256xf32>
    %22 = arith.mulf %20, %21 : vector<8x256xf32>
    %23 = vector.broadcast %17 : vector<8x1xf32> to vector<8x256xf32>
    %24 = arith.addf %22, %23 : vector<8x256xf32>
    %cst_13 = arith.constant 0.000000e+00 : f32
    %25 = vector.broadcast %cst_13 : f32 to vector<8x256xf32>
    %26 = arith.minimumf %24, %25 : vector<8x256xf32>
    %27 = math.exp %26 : vector<8x256xf32>
    %cst_14 = arith.constant 1.000000e+00 : f32
    %28 = vector.broadcast %cst_14 : f32 to vector<8x256xf32>
    %29 = arith.subf %27, %28 : vector<8x256xf32>
    %cst_15 = arith.constant 1.67326319 : f32
    %30 = vector.broadcast %cst_15 : f32 to vector<8x256xf32>
    %31 = arith.mulf %30, %29 : vector<8x256xf32>
    %cst_16 = arith.constant 0.000000e+00 : f32
    %32 = vector.broadcast %cst_16 : f32 to vector<8x256xf32>
    %33 = arith.cmpf ogt, %24, %32 : vector<8x256xf32>
    %34 = arith.select %33, %24, %31 : vector<8x256xi1>, vector<8x256xf32>
    %cst_17 = arith.constant 1.05070102 : f32
    %35 = vector.broadcast %cst_17 : f32 to vector<8x256xf32>
    %36 = arith.mulf %35, %34 : vector<8x256xf32>
    %c0_18 = arith.constant 0 : index
    %c0_19 = arith.constant 0 : index
    %c0_20 = arith.constant 0 : index
    %37 = vector.load %arg6[%c0_18, %c0_19, %c0_20] : memref<2x8x256xf32, #tpu.memory_space<vmem>>, vector<1x8x256xf32>
    %38 = vector.shape_cast %37 : vector<1x8x256xf32> to vector<8x256xf32>
    %39 = vector.shape_cast %36 : vector<8x256xf32> to vector<1x8x256xf32>
    tpu.vector_store %arg6[%c0_18, %c0_19, %c0_20], %39 {strides = array<i32>} : memref<2x8x256xf32, #tpu.memory_space<vmem>>, vector<1x8x256xf32>,
    %c1 = arith.constant 1 : index
    %c0_21 = arith.constant 0 : index
    %c0_22 = arith.constant 0 : index
    %40 = vector.load %arg1[%c1, %c0_21, %c0_22] : memref<2x8x256xbf16, #tpu.memory_space<vmem>>, vector<1x8x256xbf16>
    %41 = vector.shape_cast %40 : vector<1x8x256xbf16> to vector<8x256xbf16>
    %42 = arith.extf %41 : vector<8x256xbf16> to vector<8x256xf32>
    %43 = vector.broadcast %15 : vector<8x1xf32> to vector<8x256xf32>
    %44 = arith.mulf %42, %43 : vector<8x256xf32>
    %45 = vector.broadcast %17 : vector<8x1xf32> to vector<8x256xf32>
    %46 = arith.addf %44, %45 : vector<8x256xf32>
    %cst_23 = arith.constant 0.000000e+00 : f32
    %47 = vector.broadcast %cst_23 : f32 to vector<8x256xf32>
    %48 = arith.minimumf %46, %47 : vector<8x256xf32>
    %49 = math.exp %48 : vector<8x256xf32>
    %cst_24 = arith.constant 1.000000e+00 : f32
    %50 = vector.broadcast %cst_24 : f32 to vector<8x256xf32>
    %51 = arith.subf %49, %50 : vector<8x256xf32>
    %cst_25 = arith.constant 1.67326319 : f32
    %52 = vector.broadcast %cst_25 : f32 to vector<8x256xf32>
    %53 = arith.mulf %52, %51 : vector<8x256xf32>
    %cst_26 = arith.constant 0.000000e+00 : f32
    %54 = vector.broadcast %cst_26 : f32 to vector<8x256xf32>
    %55 = arith.cmpf ogt, %46, %54 : vector<8x256xf32>
    %56 = arith.select %55, %46, %53 : vector<8x256xi1>, vector<8x256xf32>
    %cst_27 = arith.constant 1.05070102 : f32
    %57 = vector.broadcast %cst_27 : f32 to vector<8x256xf32>
    %58 = arith.mulf %57, %56 : vector<8x256xf32>
    %c1_28 = arith.constant 1 : index
    %c0_29 = arith.constant 0 : index
    %c0_30 = arith.constant 0 : index
    %59 = vector.load %arg6[%c1_28, %c0_29, %c0_30] : memref<2x8x256xf32, #tpu.memory_space<vmem>>, vector<1x8x256xf32>
    %60 = vector.shape_cast %59 : vector<1x8x256xf32> to vector<8x256xf32>
    %61 = vector.shape_cast %58 : vector<8x256xf32> to vector<1x8x256xf32>
    tpu.vector_store %arg6[%c1_28, %c0_29, %c0_30], %61 {strides = array<i32>} : memref<2x8x256xf32, #tpu.memory_space<vmem>>, vector<1x8x256xf32>,
    return
  }
  func.func @transform_0(%arg0: i32) -> (i32, i32, i32) {
    %c0_i32 = arith.constant 0 : i32
    %c0_i32_0 = arith.constant 0 : i32
    %c0_i32_1 = arith.constant 0 : i32
    return %arg0, %c0_i32, %c0_i32_0 : i32, i32, i32
  }
  func.func @transform_1(%arg0: i32) -> (i32, i32) {
    %c0_i32 = arith.constant 0 : i32
    %c0_i32_0 = arith.constant 0 : i32
    %c0_i32_1 = arith.constant 0 : i32
    return %c0_i32, %c0_i32_0 : i32, i32
  }
  func.func @transform_2(%arg0: i32) -> (i32, i32) {
    %c0_i32 = arith.constant 0 : i32
    %c0_i32_0 = arith.constant 0 : i32
    %c0_i32_1 = arith.constant 0 : i32
    return %c0_i32, %c0_i32_0 : i32, i32
  }
  func.func @transform_3(%arg0: i32) -> (i32, i32) {
    %c0_i32 = arith.constant 0 : i32
    %c0_i32_0 = arith.constant 0 : i32
    %c0_i32_1 = arith.constant 0 : i32
    return %c0_i32, %c0_i32_0 : i32, i32
  }
  func.func @transform_4(%arg0: i32) -> (i32, i32) {
    %c0_i32 = arith.constant 0 : i32
    %c0_i32_0 = arith.constant 0 : i32
    %c0_i32_1 = arith.constant 0 : i32
    return %c0_i32, %c0_i32_0 : i32, i32
  }
  func.func @transform_5(%arg0: i32) -> (i32, i32, i32) {
    %c0_i32 = arith.constant 0 : i32
    %c0_i32_0 = arith.constant 0 : i32
    %c0_i32_1 = arith.constant 0 : i32
    return %arg0, %c0_i32, %c0_i32_0 : i32, i32, i32
  }
}

module attributes {stable_mosaic.version = 11 : i64} {
  func.func @_bn_selu_conv_stats_kernel(%arg0: i32, %arg1: i32, %arg2: memref<2x8x256xbf16, #tpu.memory_space<vmem>>, %arg3: memref<8x1xf32, #tpu.memory_space<vmem>>, %arg4: memref<8x1xf32, #tpu.memory_space<vmem>>, %arg5: memref<8x1xf32, #tpu.memory_space<vmem>>, %arg6: memref<8x1xf32, #tpu.memory_space<vmem>>, %arg7: memref<8x72xbf16, #tpu.memory_space<vmem>>, %arg8: memref<2x8x256xbf16, #tpu.memory_space<vmem>>, %arg9: memref<1x8x1xf32, #tpu.memory_space<vmem>>, %arg10: memref<1x8x1xf32, #tpu.memory_space<vmem>>, %arg11: memref<72x256xbf16, #tpu.memory_space<vmem>>) attributes {dimension_semantics = [#tpu.dimension_semantics<parallel>, #tpu.dimension_semantics<arbitrary>], iteration_bounds = array<i64: 1, 1>, scalar_prefetch = 0 : i64, scratch_operands = 1 : i64, tpu.core_type = #tpu.core_type<tc>, window_params = [{transform_indices = @transform_0, window_bounds = array<i64: 2, 8, 256>}, {pipeline_mode = #tpu.pipeline_mode<synchronous>, transform_indices = @transform_1, window_bounds = array<i64: 8, 1>}, {pipeline_mode = #tpu.pipeline_mode<synchronous>, transform_indices = @transform_2, window_bounds = array<i64: 8, 1>}, {pipeline_mode = #tpu.pipeline_mode<synchronous>, transform_indices = @transform_3, window_bounds = array<i64: 8, 1>}, {pipeline_mode = #tpu.pipeline_mode<synchronous>, transform_indices = @transform_4, window_bounds = array<i64: 8, 1>}, {pipeline_mode = #tpu.pipeline_mode<synchronous>, transform_indices = @transform_5, window_bounds = array<i64: 8, 72>}, {transform_indices = @transform_6, window_bounds = array<i64: 2, 8, 256>}, {transform_indices = @transform_7, window_bounds = array<i64: 1, 8, 1>}, {transform_indices = @transform_8, window_bounds = array<i64: 1, 8, 1>}]} {
    %c0_i32 = arith.constant 0 : i32
    %0 = arith.cmpi eq, %arg1, %c0_i32 : i32
    %1 = arith.extui %0 : i1 to i32
    %c0_i32_0 = arith.constant 0 : i32
    %2 = arith.cmpi ne, %1, %c0_i32_0 : i32
    scf.if %2 {
      %cst_135 = arith.constant 0.000000e+00 : f32
      %254 = vector.broadcast %cst_135 : f32 to vector<8x1xf32>
      %c0_136 = arith.constant 0 : index
      %c0_137 = arith.constant 0 : index
      %c0_138 = arith.constant 0 : index
      %255 = vector.load %arg9[%c0_136, %c0_137, %c0_138] : memref<1x8x1xf32, #tpu.memory_space<vmem>>, vector<1x8x1xf32>
      %256 = vector.shape_cast %255 : vector<1x8x1xf32> to vector<8x1xf32>
      %257 = vector.shape_cast %254 : vector<8x1xf32> to vector<1x8x1xf32>
      tpu.vector_store %arg9[%c0_136, %c0_137, %c0_138], %257 {strides = array<i32>} : memref<1x8x1xf32, #tpu.memory_space<vmem>>, vector<1x8x1xf32>,
      %cst_139 = arith.constant 0.000000e+00 : f32
      %258 = vector.broadcast %cst_139 : f32 to vector<8x1xf32>
      %c0_140 = arith.constant 0 : index
      %c0_141 = arith.constant 0 : index
      %c0_142 = arith.constant 0 : index
      %259 = vector.load %arg10[%c0_140, %c0_141, %c0_142] : memref<1x8x1xf32, #tpu.memory_space<vmem>>, vector<1x8x1xf32>
      %260 = vector.shape_cast %259 : vector<1x8x1xf32> to vector<8x1xf32>
      %261 = vector.shape_cast %258 : vector<8x1xf32> to vector<1x8x1xf32>
      tpu.vector_store %arg10[%c0_140, %c0_141, %c0_142], %261 {strides = array<i32>} : memref<1x8x1xf32, #tpu.memory_space<vmem>>, vector<1x8x1xf32>,
    } else {
    }
    %c0 = arith.constant 0 : index
    %c0_1 = arith.constant 0 : index
    %3 = vector.load %arg3[%c0, %c0_1] : memref<8x1xf32, #tpu.memory_space<vmem>>, vector<8x1xf32>
    %c0_2 = arith.constant 0 : index
    %c0_3 = arith.constant 0 : index
    %4 = vector.load %arg4[%c0_2, %c0_3] : memref<8x1xf32, #tpu.memory_space<vmem>>, vector<8x1xf32>
    %c0_4 = arith.constant 0 : index
    %c0_5 = arith.constant 0 : index
    %5 = vector.load %arg5[%c0_4, %c0_5] : memref<8x1xf32, #tpu.memory_space<vmem>>, vector<8x1xf32>
    %c0_6 = arith.constant 0 : index
    %c0_7 = arith.constant 0 : index
    %6 = vector.load %arg6[%c0_6, %c0_7] : memref<8x1xf32, #tpu.memory_space<vmem>>, vector<8x1xf32>
    %cst = arith.constant 0.001953125 : f32
    %7 = vector.broadcast %cst : f32 to vector<8x1xf32>
    %8 = arith.mulf %3, %7 : vector<8x1xf32>
    %cst_8 = arith.constant 0.001953125 : f32
    %9 = vector.broadcast %cst_8 : f32 to vector<8x1xf32>
    %10 = arith.mulf %4, %9 : vector<8x1xf32>
    %11 = arith.mulf %8, %8 : vector<8x1xf32>
    %12 = arith.subf %10, %11 : vector<8x1xf32>
    %cst_9 = arith.constant 0.000000e+00 : f32
    %13 = vector.broadcast %cst_9 : f32 to vector<8x1xf32>
    %14 = arith.maximumf %12, %13 : vector<8x1xf32>
    %cst_10 = arith.constant 9.99999974E-6 : f32
    %15 = vector.broadcast %cst_10 : f32 to vector<8x1xf32>
    %16 = arith.addf %14, %15 : vector<8x1xf32>
    %17 = math.rsqrt %16 : vector<8x1xf32>
    %18 = arith.mulf %5, %17 : vector<8x1xf32>
    %19 = arith.mulf %18, %8 : vector<8x1xf32>
    %20 = arith.subf %6, %19 : vector<8x1xf32>
    %21 = tpu.iota {dimensions = array<i32: 1>} : vector<1x256xi32>
    %c15_i32 = arith.constant 15 : i32
    %22 = vector.broadcast %c15_i32 : i32 to vector<1x256xi32>
    %23 = arith.andi %21, %22 : vector<1x256xi32>
    %c16_i32 = arith.constant 16 : i32
    %24 = vector.broadcast %c16_i32 : i32 to vector<1x256xi32>
    %25 = arith.cmpi sge, %21, %24 : vector<1x256xi32>
    %c1_i32 = arith.constant 1 : i32
    %26 = vector.broadcast %c1_i32 : i32 to vector<1x256xi32>
    %27 = arith.cmpi sge, %23, %26 : vector<1x256xi32>
    %28 = arith.andi %25, %27 : vector<1x256xi1>
    %c16_i32_11 = arith.constant 16 : i32
    %29 = vector.broadcast %c16_i32_11 : i32 to vector<1x256xi32>
    %30 = arith.cmpi sge, %21, %29 : vector<1x256xi32>
    %c16_i32_12 = arith.constant 16 : i32
    %31 = vector.broadcast %c16_i32_12 : i32 to vector<1x256xi32>
    %32 = arith.cmpi sge, %21, %31 : vector<1x256xi32>
    %c15_i32_13 = arith.constant 15 : i32
    %33 = vector.broadcast %c15_i32_13 : i32 to vector<1x256xi32>
    %34 = arith.cmpi slt, %23, %33 : vector<1x256xi32>
    %35 = arith.andi %32, %34 : vector<1x256xi1>
    %c1_i32_14 = arith.constant 1 : i32
    %36 = vector.broadcast %c1_i32_14 : i32 to vector<1x256xi32>
    %37 = arith.cmpi sge, %23, %36 : vector<1x256xi32>
    %c15_i32_15 = arith.constant 15 : i32
    %38 = vector.broadcast %c15_i32_15 : i32 to vector<1x256xi32>
    %39 = arith.cmpi slt, %23, %38 : vector<1x256xi32>
    %c240_i32 = arith.constant 240 : i32
    %40 = vector.broadcast %c240_i32 : i32 to vector<1x256xi32>
    %41 = arith.cmpi slt, %21, %40 : vector<1x256xi32>
    %c1_i32_16 = arith.constant 1 : i32
    %42 = vector.broadcast %c1_i32_16 : i32 to vector<1x256xi32>
    %43 = arith.cmpi sge, %23, %42 : vector<1x256xi32>
    %44 = arith.andi %41, %43 : vector<1x256xi1>
    %c240_i32_17 = arith.constant 240 : i32
    %45 = vector.broadcast %c240_i32_17 : i32 to vector<1x256xi32>
    %46 = arith.cmpi slt, %21, %45 : vector<1x256xi32>
    %c240_i32_18 = arith.constant 240 : i32
    %47 = vector.broadcast %c240_i32_18 : i32 to vector<1x256xi32>
    %48 = arith.cmpi slt, %21, %47 : vector<1x256xi32>
    %c15_i32_19 = arith.constant 15 : i32
    %49 = vector.broadcast %c15_i32_19 : i32 to vector<1x256xi32>
    %50 = arith.cmpi slt, %23, %49 : vector<1x256xi32>
    %51 = arith.andi %48, %50 : vector<1x256xi1>
    %c0_20 = arith.constant 0 : index
    %c0_21 = arith.constant 0 : index
    %c0_22 = arith.constant 0 : index
    %52 = vector.load %arg2[%c0_20, %c0_21, %c0_22] : memref<2x8x256xbf16, #tpu.memory_space<vmem>>, vector<1x8x256xbf16>
    %53 = vector.shape_cast %52 : vector<1x8x256xbf16> to vector<8x256xbf16>
    %54 = arith.extf %53 : vector<8x256xbf16> to vector<8x256xf32>
    %55 = vector.broadcast %18 : vector<8x1xf32> to vector<8x256xf32>
    %56 = arith.mulf %54, %55 : vector<8x256xf32>
    %57 = vector.broadcast %20 : vector<8x1xf32> to vector<8x256xf32>
    %58 = arith.addf %56, %57 : vector<8x256xf32>
    %cst_23 = arith.constant 0.000000e+00 : f32
    %59 = vector.broadcast %cst_23 : f32 to vector<8x256xf32>
    %60 = arith.minimumf %58, %59 : vector<8x256xf32>
    %61 = math.exp %60 : vector<8x256xf32>
    %cst_24 = arith.constant 1.000000e+00 : f32
    %62 = vector.broadcast %cst_24 : f32 to vector<8x256xf32>
    %63 = arith.subf %61, %62 : vector<8x256xf32>
    %cst_25 = arith.constant 1.67326319 : f32
    %64 = vector.broadcast %cst_25 : f32 to vector<8x256xf32>
    %65 = arith.mulf %64, %63 : vector<8x256xf32>
    %cst_26 = arith.constant 0.000000e+00 : f32
    %66 = vector.broadcast %cst_26 : f32 to vector<8x256xf32>
    %67 = arith.cmpf ogt, %58, %66 : vector<8x256xf32>
    %68 = arith.select %67, %58, %65 : vector<8x256xi1>, vector<8x256xf32>
    %cst_27 = arith.constant 1.05070102 : f32
    %69 = vector.broadcast %cst_27 : f32 to vector<8x256xf32>
    %70 = arith.mulf %69, %68 : vector<8x256xf32>
    %c17_i32 = arith.constant 17 : i32
    %71 = tpu.dynamic_rotate %70 by %c17_i32 dim 1 : vector<8x256xf32>, i32 -> vector<8x256xf32>
    %cst_28 = arith.constant 0.000000e+00 : f32
    %72 = vector.shape_cast %28 : vector<1x256xi1> to vector<1x256xi1>
    %73 = vector.broadcast %72 : vector<1x256xi1> to vector<8x256xi1>
    %74 = vector.broadcast %cst_28 : f32 to vector<8x256xf32>
    %75 = arith.select %73, %71, %74 : vector<8x256xi1>, vector<8x256xf32>
    %76 = arith.truncf %75 : vector<8x256xf32> to vector<8x256xbf16>
    %c0_29 = arith.constant 0 : index
    %c0_30 = arith.constant 0 : index
    %77 = vector.load %arg11[%c0_29, %c0_30] : memref<72x256xbf16, #tpu.memory_space<vmem>>, vector<8x256xbf16>
    tpu.vector_store %arg11[%c0_29, %c0_30], %76 {strides = array<i32>} : memref<72x256xbf16, #tpu.memory_space<vmem>>, vector<8x256xbf16>,
    %c16_i32_31 = arith.constant 16 : i32
    %78 = tpu.dynamic_rotate %70 by %c16_i32_31 dim 1 : vector<8x256xf32>, i32 -> vector<8x256xf32>
    %cst_32 = arith.constant 0.000000e+00 : f32
    %79 = vector.shape_cast %30 : vector<1x256xi1> to vector<1x256xi1>
    %80 = vector.broadcast %79 : vector<1x256xi1> to vector<8x256xi1>
    %81 = vector.broadcast %cst_32 : f32 to vector<8x256xf32>
    %82 = arith.select %80, %78, %81 : vector<8x256xi1>, vector<8x256xf32>
    %83 = arith.truncf %82 : vector<8x256xf32> to vector<8x256xbf16>
    %c8 = arith.constant 8 : index
    %c0_33 = arith.constant 0 : index
    %84 = vector.load %arg11[%c8, %c0_33] : memref<72x256xbf16, #tpu.memory_space<vmem>>, vector<8x256xbf16>
    tpu.vector_store %arg11[%c8, %c0_33], %83 {strides = array<i32>} : memref<72x256xbf16, #tpu.memory_space<vmem>>, vector<8x256xbf16>,
    %c15_i32_34 = arith.constant 15 : i32
    %85 = tpu.dynamic_rotate %70 by %c15_i32_34 dim 1 : vector<8x256xf32>, i32 -> vector<8x256xf32>
    %cst_35 = arith.constant 0.000000e+00 : f32
    %86 = vector.shape_cast %35 : vector<1x256xi1> to vector<1x256xi1>
    %87 = vector.broadcast %86 : vector<1x256xi1> to vector<8x256xi1>
    %88 = vector.broadcast %cst_35 : f32 to vector<8x256xf32>
    %89 = arith.select %87, %85, %88 : vector<8x256xi1>, vector<8x256xf32>
    %90 = arith.truncf %89 : vector<8x256xf32> to vector<8x256xbf16>
    %c16 = arith.constant 16 : index
    %c0_36 = arith.constant 0 : index
    %91 = vector.load %arg11[%c16, %c0_36] : memref<72x256xbf16, #tpu.memory_space<vmem>>, vector<8x256xbf16>
    tpu.vector_store %arg11[%c16, %c0_36], %90 {strides = array<i32>} : memref<72x256xbf16, #tpu.memory_space<vmem>>, vector<8x256xbf16>,
    %c1_i32_37 = arith.constant 1 : i32
    %92 = tpu.dynamic_rotate %70 by %c1_i32_37 dim 1 : vector<8x256xf32>, i32 -> vector<8x256xf32>
    %cst_38 = arith.constant 0.000000e+00 : f32
    %93 = vector.shape_cast %37 : vector<1x256xi1> to vector<1x256xi1>
    %94 = vector.broadcast %93 : vector<1x256xi1> to vector<8x256xi1>
    %95 = vector.broadcast %cst_38 : f32 to vector<8x256xf32>
    %96 = arith.select %94, %92, %95 : vector<8x256xi1>, vector<8x256xf32>
    %97 = arith.truncf %96 : vector<8x256xf32> to vector<8x256xbf16>
    %c24 = arith.constant 24 : index
    %c0_39 = arith.constant 0 : index
    %98 = vector.load %arg11[%c24, %c0_39] : memref<72x256xbf16, #tpu.memory_space<vmem>>, vector<8x256xbf16>
    tpu.vector_store %arg11[%c24, %c0_39], %97 {strides = array<i32>} : memref<72x256xbf16, #tpu.memory_space<vmem>>, vector<8x256xbf16>,
    %99 = arith.truncf %70 : vector<8x256xf32> to vector<8x256xbf16>
    %c32 = arith.constant 32 : index
    %c0_40 = arith.constant 0 : index
    %100 = vector.load %arg11[%c32, %c0_40] : memref<72x256xbf16, #tpu.memory_space<vmem>>, vector<8x256xbf16>
    tpu.vector_store %arg11[%c32, %c0_40], %99 {strides = array<i32>} : memref<72x256xbf16, #tpu.memory_space<vmem>>, vector<8x256xbf16>,
    %c255_i32 = arith.constant 255 : i32
    %101 = tpu.dynamic_rotate %70 by %c255_i32 dim 1 : vector<8x256xf32>, i32 -> vector<8x256xf32>
    %cst_41 = arith.constant 0.000000e+00 : f32
    %102 = vector.shape_cast %39 : vector<1x256xi1> to vector<1x256xi1>
    %103 = vector.broadcast %102 : vector<1x256xi1> to vector<8x256xi1>
    %104 = vector.broadcast %cst_41 : f32 to vector<8x256xf32>
    %105 = arith.select %103, %101, %104 : vector<8x256xi1>, vector<8x256xf32>
    %106 = arith.truncf %105 : vector<8x256xf32> to vector<8x256xbf16>
    %c40 = arith.constant 40 : index
    %c0_42 = arith.constant 0 : index
    %107 = vector.load %arg11[%c40, %c0_42] : memref<72x256xbf16, #tpu.memory_space<vmem>>, vector<8x256xbf16>
    tpu.vector_store %arg11[%c40, %c0_42], %106 {strides = array<i32>} : memref<72x256xbf16, #tpu.memory_space<vmem>>, vector<8x256xbf16>,
    %c241_i32 = arith.constant 241 : i32
    %108 = tpu.dynamic_rotate %70 by %c241_i32 dim 1 : vector<8x256xf32>, i32 -> vector<8x256xf32>
    %cst_43 = arith.constant 0.000000e+00 : f32
    %109 = vector.shape_cast %44 : vector<1x256xi1> to vector<1x256xi1>
    %110 = vector.broadcast %109 : vector<1x256xi1> to vector<8x256xi1>
    %111 = vector.broadcast %cst_43 : f32 to vector<8x256xf32>
    %112 = arith.select %110, %108, %111 : vector<8x256xi1>, vector<8x256xf32>
    %113 = arith.truncf %112 : vector<8x256xf32> to vector<8x256xbf16>
    %c48 = arith.constant 48 : index
    %c0_44 = arith.constant 0 : index
    %114 = vector.load %arg11[%c48, %c0_44] : memref<72x256xbf16, #tpu.memory_space<vmem>>, vector<8x256xbf16>
    tpu.vector_store %arg11[%c48, %c0_44], %113 {strides = array<i32>} : memref<72x256xbf16, #tpu.memory_space<vmem>>, vector<8x256xbf16>,
    %c240_i32_45 = arith.constant 240 : i32
    %115 = tpu.dynamic_rotate %70 by %c240_i32_45 dim 1 : vector<8x256xf32>, i32 -> vector<8x256xf32>
    %cst_46 = arith.constant 0.000000e+00 : f32
    %116 = vector.shape_cast %46 : vector<1x256xi1> to vector<1x256xi1>
    %117 = vector.broadcast %116 : vector<1x256xi1> to vector<8x256xi1>
    %118 = vector.broadcast %cst_46 : f32 to vector<8x256xf32>
    %119 = arith.select %117, %115, %118 : vector<8x256xi1>, vector<8x256xf32>
    %120 = arith.truncf %119 : vector<8x256xf32> to vector<8x256xbf16>
    %c56 = arith.constant 56 : index
    %c0_47 = arith.constant 0 : index
    %121 = vector.load %arg11[%c56, %c0_47] : memref<72x256xbf16, #tpu.memory_space<vmem>>, vector<8x256xbf16>
    tpu.vector_store %arg11[%c56, %c0_47], %120 {strides = array<i32>} : memref<72x256xbf16, #tpu.memory_space<vmem>>, vector<8x256xbf16>,
    %c239_i32 = arith.constant 239 : i32
    %122 = tpu.dynamic_rotate %70 by %c239_i32 dim 1 : vector<8x256xf32>, i32 -> vector<8x256xf32>
    %cst_48 = arith.constant 0.000000e+00 : f32
    %123 = vector.shape_cast %51 : vector<1x256xi1> to vector<1x256xi1>
    %124 = vector.broadcast %123 : vector<1x256xi1> to vector<8x256xi1>
    %125 = vector.broadcast %cst_48 : f32 to vector<8x256xf32>
    %126 = arith.select %124, %122, %125 : vector<8x256xi1>, vector<8x256xf32>
    %127 = arith.truncf %126 : vector<8x256xf32> to vector<8x256xbf16>
    %c64 = arith.constant 64 : index
    %c0_49 = arith.constant 0 : index
    %128 = vector.load %arg11[%c64, %c0_49] : memref<72x256xbf16, #tpu.memory_space<vmem>>, vector<8x256xbf16>
    tpu.vector_store %arg11[%c64, %c0_49], %127 {strides = array<i32>} : memref<72x256xbf16, #tpu.memory_space<vmem>>, vector<8x256xbf16>,
    %c0_50 = arith.constant 0 : index
    %c0_51 = arith.constant 0 : index
    %129 = vector.load %arg7[%c0_50, %c0_51] : memref<8x72xbf16, #tpu.memory_space<vmem>>, vector<8x72xbf16>
    %c0_52 = arith.constant 0 : index
    %c0_53 = arith.constant 0 : index
    %130 = vector.load %arg11[%c0_52, %c0_53] : memref<72x256xbf16, #tpu.memory_space<vmem>>, vector<72x256xbf16>
    %cst_54 = arith.constant dense<0.000000e+00> : vector<8x256xf32>
    %131 = tpu.matmul %129, %130, %cst_54 {dimension_numbers = #tpu.dot_dimension_numbers<[1], [0], [0], [1], [0, 0, 1, 1], [], []>} : vector<8x72xbf16>, vector<72x256xbf16>, vector<8x256xf32> -> vector<8x256xf32>
    %132 = arith.truncf %131 : vector<8x256xf32> to vector<8x256xbf16>
    %c0_55 = arith.constant 0 : index
    %c0_56 = arith.constant 0 : index
    %c0_57 = arith.constant 0 : index
    %133 = vector.load %arg8[%c0_55, %c0_56, %c0_57] : memref<2x8x256xbf16, #tpu.memory_space<vmem>>, vector<1x8x256xbf16>
    %134 = vector.shape_cast %133 : vector<1x8x256xbf16> to vector<8x256xbf16>
    %135 = vector.shape_cast %132 : vector<8x256xbf16> to vector<1x8x256xbf16>
    tpu.vector_store %arg8[%c0_55, %c0_56, %c0_57], %135 {strides = array<i32>} : memref<2x8x256xbf16, #tpu.memory_space<vmem>>, vector<1x8x256xbf16>,
    %c0_58 = arith.constant 0 : index
    %c0_59 = arith.constant 0 : index
    %c0_60 = arith.constant 0 : index
    %136 = vector.load %arg9[%c0_58, %c0_59, %c0_60] : memref<1x8x1xf32, #tpu.memory_space<vmem>>, vector<1x8x1xf32>
    %137 = vector.shape_cast %136 : vector<1x8x1xf32> to vector<8x1xf32>
    %cst_61 = arith.constant dense<0.000000e+00> : vector<8xf32>
    %138 = vector.multi_reduction <add>, %131, %cst_61 [1] : vector<8x256xf32> to vector<8xf32>
    %139 = vector.shape_cast %138 : vector<8xf32> to vector<8x1xf32>
    %140 = arith.addf %137, %139 : vector<8x1xf32>
    %c0_62 = arith.constant 0 : index
    %c0_63 = arith.constant 0 : index
    %c0_64 = arith.constant 0 : index
    %141 = vector.load %arg9[%c0_62, %c0_63, %c0_64] : memref<1x8x1xf32, #tpu.memory_space<vmem>>, vector<1x8x1xf32>
    %142 = vector.shape_cast %141 : vector<1x8x1xf32> to vector<8x1xf32>
    %143 = vector.shape_cast %140 : vector<8x1xf32> to vector<1x8x1xf32>
    tpu.vector_store %arg9[%c0_62, %c0_63, %c0_64], %143 {strides = array<i32>} : memref<1x8x1xf32, #tpu.memory_space<vmem>>, vector<1x8x1xf32>,
    %c0_65 = arith.constant 0 : index
    %c0_66 = arith.constant 0 : index
    %c0_67 = arith.constant 0 : index
    %144 = vector.load %arg10[%c0_65, %c0_66, %c0_67] : memref<1x8x1xf32, #tpu.memory_space<vmem>>, vector<1x8x1xf32>
    %145 = vector.shape_cast %144 : vector<1x8x1xf32> to vector<8x1xf32>
    %146 = arith.mulf %131, %131 : vector<8x256xf32>
    %cst_68 = arith.constant dense<0.000000e+00> : vector<8xf32>
    %147 = vector.multi_reduction <add>, %146, %cst_68 [1] : vector<8x256xf32> to vector<8xf32>
    %148 = vector.shape_cast %147 : vector<8xf32> to vector<8x1xf32>
    %149 = arith.addf %145, %148 : vector<8x1xf32>
    %c0_69 = arith.constant 0 : index
    %c0_70 = arith.constant 0 : index
    %c0_71 = arith.constant 0 : index
    %150 = vector.load %arg10[%c0_69, %c0_70, %c0_71] : memref<1x8x1xf32, #tpu.memory_space<vmem>>, vector<1x8x1xf32>
    %151 = vector.shape_cast %150 : vector<1x8x1xf32> to vector<8x1xf32>
    %152 = vector.shape_cast %149 : vector<8x1xf32> to vector<1x8x1xf32>
    tpu.vector_store %arg10[%c0_69, %c0_70, %c0_71], %152 {strides = array<i32>} : memref<1x8x1xf32, #tpu.memory_space<vmem>>, vector<1x8x1xf32>,
    %c1 = arith.constant 1 : index
    %c0_72 = arith.constant 0 : index
    %c0_73 = arith.constant 0 : index
    %153 = vector.load %arg2[%c1, %c0_72, %c0_73] : memref<2x8x256xbf16, #tpu.memory_space<vmem>>, vector<1x8x256xbf16>
    %154 = vector.shape_cast %153 : vector<1x8x256xbf16> to vector<8x256xbf16>
    %155 = arith.extf %154 : vector<8x256xbf16> to vector<8x256xf32>
    %156 = vector.broadcast %18 : vector<8x1xf32> to vector<8x256xf32>
    %157 = arith.mulf %155, %156 : vector<8x256xf32>
    %158 = vector.broadcast %20 : vector<8x1xf32> to vector<8x256xf32>
    %159 = arith.addf %157, %158 : vector<8x256xf32>
    %cst_74 = arith.constant 0.000000e+00 : f32
    %160 = vector.broadcast %cst_74 : f32 to vector<8x256xf32>
    %161 = arith.minimumf %159, %160 : vector<8x256xf32>
    %162 = math.exp %161 : vector<8x256xf32>
    %cst_75 = arith.constant 1.000000e+00 : f32
    %163 = vector.broadcast %cst_75 : f32 to vector<8x256xf32>
    %164 = arith.subf %162, %163 : vector<8x256xf32>
    %cst_76 = arith.constant 1.67326319 : f32
    %165 = vector.broadcast %cst_76 : f32 to vector<8x256xf32>
    %166 = arith.mulf %165, %164 : vector<8x256xf32>
    %cst_77 = arith.constant 0.000000e+00 : f32
    %167 = vector.broadcast %cst_77 : f32 to vector<8x256xf32>
    %168 = arith.cmpf ogt, %159, %167 : vector<8x256xf32>
    %169 = arith.select %168, %159, %166 : vector<8x256xi1>, vector<8x256xf32>
    %cst_78 = arith.constant 1.05070102 : f32
    %170 = vector.broadcast %cst_78 : f32 to vector<8x256xf32>
    %171 = arith.mulf %170, %169 : vector<8x256xf32>
    %c17_i32_79 = arith.constant 17 : i32
    %172 = tpu.dynamic_rotate %171 by %c17_i32_79 dim 1 : vector<8x256xf32>, i32 -> vector<8x256xf32>
    %cst_80 = arith.constant 0.000000e+00 : f32
    %173 = vector.shape_cast %28 : vector<1x256xi1> to vector<1x256xi1>
    %174 = vector.broadcast %173 : vector<1x256xi1> to vector<8x256xi1>
    %175 = vector.broadcast %cst_80 : f32 to vector<8x256xf32>
    %176 = arith.select %174, %172, %175 : vector<8x256xi1>, vector<8x256xf32>
    %177 = arith.truncf %176 : vector<8x256xf32> to vector<8x256xbf16>
    %c0_81 = arith.constant 0 : index
    %c0_82 = arith.constant 0 : index
    %178 = vector.load %arg11[%c0_81, %c0_82] : memref<72x256xbf16, #tpu.memory_space<vmem>>, vector<8x256xbf16>
    tpu.vector_store %arg11[%c0_81, %c0_82], %177 {strides = array<i32>} : memref<72x256xbf16, #tpu.memory_space<vmem>>, vector<8x256xbf16>,
    %c16_i32_83 = arith.constant 16 : i32
    %179 = tpu.dynamic_rotate %171 by %c16_i32_83 dim 1 : vector<8x256xf32>, i32 -> vector<8x256xf32>
    %cst_84 = arith.constant 0.000000e+00 : f32
    %180 = vector.shape_cast %30 : vector<1x256xi1> to vector<1x256xi1>
    %181 = vector.broadcast %180 : vector<1x256xi1> to vector<8x256xi1>
    %182 = vector.broadcast %cst_84 : f32 to vector<8x256xf32>
    %183 = arith.select %181, %179, %182 : vector<8x256xi1>, vector<8x256xf32>
    %184 = arith.truncf %183 : vector<8x256xf32> to vector<8x256xbf16>
    %c8_85 = arith.constant 8 : index
    %c0_86 = arith.constant 0 : index
    %185 = vector.load %arg11[%c8_85, %c0_86] : memref<72x256xbf16, #tpu.memory_space<vmem>>, vector<8x256xbf16>
    tpu.vector_store %arg11[%c8_85, %c0_86], %184 {strides = array<i32>} : memref<72x256xbf16, #tpu.memory_space<vmem>>, vector<8x256xbf16>,
    %c15_i32_87 = arith.constant 15 : i32
    %186 = tpu.dynamic_rotate %171 by %c15_i32_87 dim 1 : vector<8x256xf32>, i32 -> vector<8x256xf32>
    %cst_88 = arith.constant 0.000000e+00 : f32
    %187 = vector.shape_cast %35 : vector<1x256xi1> to vector<1x256xi1>
    %188 = vector.broadcast %187 : vector<1x256xi1> to vector<8x256xi1>
    %189 = vector.broadcast %cst_88 : f32 to vector<8x256xf32>
    %190 = arith.select %188, %186, %189 : vector<8x256xi1>, vector<8x256xf32>
    %191 = arith.truncf %190 : vector<8x256xf32> to vector<8x256xbf16>
    %c16_89 = arith.constant 16 : index
    %c0_90 = arith.constant 0 : index
    %192 = vector.load %arg11[%c16_89, %c0_90] : memref<72x256xbf16, #tpu.memory_space<vmem>>, vector<8x256xbf16>
    tpu.vector_store %arg11[%c16_89, %c0_90], %191 {strides = array<i32>} : memref<72x256xbf16, #tpu.memory_space<vmem>>, vector<8x256xbf16>,
    %c1_i32_91 = arith.constant 1 : i32
    %193 = tpu.dynamic_rotate %171 by %c1_i32_91 dim 1 : vector<8x256xf32>, i32 -> vector<8x256xf32>
    %cst_92 = arith.constant 0.000000e+00 : f32
    %194 = vector.shape_cast %37 : vector<1x256xi1> to vector<1x256xi1>
    %195 = vector.broadcast %194 : vector<1x256xi1> to vector<8x256xi1>
    %196 = vector.broadcast %cst_92 : f32 to vector<8x256xf32>
    %197 = arith.select %195, %193, %196 : vector<8x256xi1>, vector<8x256xf32>
    %198 = arith.truncf %197 : vector<8x256xf32> to vector<8x256xbf16>
    %c24_93 = arith.constant 24 : index
    %c0_94 = arith.constant 0 : index
    %199 = vector.load %arg11[%c24_93, %c0_94] : memref<72x256xbf16, #tpu.memory_space<vmem>>, vector<8x256xbf16>
    tpu.vector_store %arg11[%c24_93, %c0_94], %198 {strides = array<i32>} : memref<72x256xbf16, #tpu.memory_space<vmem>>, vector<8x256xbf16>,
    %200 = arith.truncf %171 : vector<8x256xf32> to vector<8x256xbf16>
    %c32_95 = arith.constant 32 : index
    %c0_96 = arith.constant 0 : index
    %201 = vector.load %arg11[%c32_95, %c0_96] : memref<72x256xbf16, #tpu.memory_space<vmem>>, vector<8x256xbf16>
    tpu.vector_store %arg11[%c32_95, %c0_96], %200 {strides = array<i32>} : memref<72x256xbf16, #tpu.memory_space<vmem>>, vector<8x256xbf16>,
    %c255_i32_97 = arith.constant 255 : i32
    %202 = tpu.dynamic_rotate %171 by %c255_i32_97 dim 1 : vector<8x256xf32>, i32 -> vector<8x256xf32>
    %cst_98 = arith.constant 0.000000e+00 : f32
    %203 = vector.shape_cast %39 : vector<1x256xi1> to vector<1x256xi1>
    %204 = vector.broadcast %203 : vector<1x256xi1> to vector<8x256xi1>
    %205 = vector.broadcast %cst_98 : f32 to vector<8x256xf32>
    %206 = arith.select %204, %202, %205 : vector<8x256xi1>, vector<8x256xf32>
    %207 = arith.truncf %206 : vector<8x256xf32> to vector<8x256xbf16>
    %c40_99 = arith.constant 40 : index
    %c0_100 = arith.constant 0 : index
    %208 = vector.load %arg11[%c40_99, %c0_100] : memref<72x256xbf16, #tpu.memory_space<vmem>>, vector<8x256xbf16>
    tpu.vector_store %arg11[%c40_99, %c0_100], %207 {strides = array<i32>} : memref<72x256xbf16, #tpu.memory_space<vmem>>, vector<8x256xbf16>,
    %c241_i32_101 = arith.constant 241 : i32
    %209 = tpu.dynamic_rotate %171 by %c241_i32_101 dim 1 : vector<8x256xf32>, i32 -> vector<8x256xf32>
    %cst_102 = arith.constant 0.000000e+00 : f32
    %210 = vector.shape_cast %44 : vector<1x256xi1> to vector<1x256xi1>
    %211 = vector.broadcast %210 : vector<1x256xi1> to vector<8x256xi1>
    %212 = vector.broadcast %cst_102 : f32 to vector<8x256xf32>
    %213 = arith.select %211, %209, %212 : vector<8x256xi1>, vector<8x256xf32>
    %214 = arith.truncf %213 : vector<8x256xf32> to vector<8x256xbf16>
    %c48_103 = arith.constant 48 : index
    %c0_104 = arith.constant 0 : index
    %215 = vector.load %arg11[%c48_103, %c0_104] : memref<72x256xbf16, #tpu.memory_space<vmem>>, vector<8x256xbf16>
    tpu.vector_store %arg11[%c48_103, %c0_104], %214 {strides = array<i32>} : memref<72x256xbf16, #tpu.memory_space<vmem>>, vector<8x256xbf16>,
    %c240_i32_105 = arith.constant 240 : i32
    %216 = tpu.dynamic_rotate %171 by %c240_i32_105 dim 1 : vector<8x256xf32>, i32 -> vector<8x256xf32>
    %cst_106 = arith.constant 0.000000e+00 : f32
    %217 = vector.shape_cast %46 : vector<1x256xi1> to vector<1x256xi1>
    %218 = vector.broadcast %217 : vector<1x256xi1> to vector<8x256xi1>
    %219 = vector.broadcast %cst_106 : f32 to vector<8x256xf32>
    %220 = arith.select %218, %216, %219 : vector<8x256xi1>, vector<8x256xf32>
    %221 = arith.truncf %220 : vector<8x256xf32> to vector<8x256xbf16>
    %c56_107 = arith.constant 56 : index
    %c0_108 = arith.constant 0 : index
    %222 = vector.load %arg11[%c56_107, %c0_108] : memref<72x256xbf16, #tpu.memory_space<vmem>>, vector<8x256xbf16>
    tpu.vector_store %arg11[%c56_107, %c0_108], %221 {strides = array<i32>} : memref<72x256xbf16, #tpu.memory_space<vmem>>, vector<8x256xbf16>,
    %c239_i32_109 = arith.constant 239 : i32
    %223 = tpu.dynamic_rotate %171 by %c239_i32_109 dim 1 : vector<8x256xf32>, i32 -> vector<8x256xf32>
    %cst_110 = arith.constant 0.000000e+00 : f32
    %224 = vector.shape_cast %51 : vector<1x256xi1> to vector<1x256xi1>
    %225 = vector.broadcast %224 : vector<1x256xi1> to vector<8x256xi1>
    %226 = vector.broadcast %cst_110 : f32 to vector<8x256xf32>
    %227 = arith.select %225, %223, %226 : vector<8x256xi1>, vector<8x256xf32>
    %228 = arith.truncf %227 : vector<8x256xf32> to vector<8x256xbf16>
    %c64_111 = arith.constant 64 : index
    %c0_112 = arith.constant 0 : index
    %229 = vector.load %arg11[%c64_111, %c0_112] : memref<72x256xbf16, #tpu.memory_space<vmem>>, vector<8x256xbf16>
    tpu.vector_store %arg11[%c64_111, %c0_112], %228 {strides = array<i32>} : memref<72x256xbf16, #tpu.memory_space<vmem>>, vector<8x256xbf16>,
    %c0_113 = arith.constant 0 : index
    %c0_114 = arith.constant 0 : index
    %230 = vector.load %arg7[%c0_113, %c0_114] : memref<8x72xbf16, #tpu.memory_space<vmem>>, vector<8x72xbf16>
    %c0_115 = arith.constant 0 : index
    %c0_116 = arith.constant 0 : index
    %231 = vector.load %arg11[%c0_115, %c0_116] : memref<72x256xbf16, #tpu.memory_space<vmem>>, vector<72x256xbf16>
    %cst_117 = arith.constant dense<0.000000e+00> : vector<8x256xf32>
    %232 = tpu.matmul %230, %231, %cst_117 {dimension_numbers = #tpu.dot_dimension_numbers<[1], [0], [0], [1], [0, 0, 1, 1], [], []>} : vector<8x72xbf16>, vector<72x256xbf16>, vector<8x256xf32> -> vector<8x256xf32>
    %233 = arith.truncf %232 : vector<8x256xf32> to vector<8x256xbf16>
    %c1_118 = arith.constant 1 : index
    %c0_119 = arith.constant 0 : index
    %c0_120 = arith.constant 0 : index
    %234 = vector.load %arg8[%c1_118, %c0_119, %c0_120] : memref<2x8x256xbf16, #tpu.memory_space<vmem>>, vector<1x8x256xbf16>
    %235 = vector.shape_cast %234 : vector<1x8x256xbf16> to vector<8x256xbf16>
    %236 = vector.shape_cast %233 : vector<8x256xbf16> to vector<1x8x256xbf16>
    tpu.vector_store %arg8[%c1_118, %c0_119, %c0_120], %236 {strides = array<i32>} : memref<2x8x256xbf16, #tpu.memory_space<vmem>>, vector<1x8x256xbf16>,
    %c0_121 = arith.constant 0 : index
    %c0_122 = arith.constant 0 : index
    %c0_123 = arith.constant 0 : index
    %237 = vector.load %arg9[%c0_121, %c0_122, %c0_123] : memref<1x8x1xf32, #tpu.memory_space<vmem>>, vector<1x8x1xf32>
    %238 = vector.shape_cast %237 : vector<1x8x1xf32> to vector<8x1xf32>
    %cst_124 = arith.constant dense<0.000000e+00> : vector<8xf32>
    %239 = vector.multi_reduction <add>, %232, %cst_124 [1] : vector<8x256xf32> to vector<8xf32>
    %240 = vector.shape_cast %239 : vector<8xf32> to vector<8x1xf32>
    %241 = arith.addf %238, %240 : vector<8x1xf32>
    %c0_125 = arith.constant 0 : index
    %c0_126 = arith.constant 0 : index
    %c0_127 = arith.constant 0 : index
    %242 = vector.load %arg9[%c0_125, %c0_126, %c0_127] : memref<1x8x1xf32, #tpu.memory_space<vmem>>, vector<1x8x1xf32>
    %243 = vector.shape_cast %242 : vector<1x8x1xf32> to vector<8x1xf32>
    %244 = vector.shape_cast %241 : vector<8x1xf32> to vector<1x8x1xf32>
    tpu.vector_store %arg9[%c0_125, %c0_126, %c0_127], %244 {strides = array<i32>} : memref<1x8x1xf32, #tpu.memory_space<vmem>>, vector<1x8x1xf32>,
    %c0_128 = arith.constant 0 : index
    %c0_129 = arith.constant 0 : index
    %c0_130 = arith.constant 0 : index
    %245 = vector.load %arg10[%c0_128, %c0_129, %c0_130] : memref<1x8x1xf32, #tpu.memory_space<vmem>>, vector<1x8x1xf32>
    %246 = vector.shape_cast %245 : vector<1x8x1xf32> to vector<8x1xf32>
    %247 = arith.mulf %232, %232 : vector<8x256xf32>
    %cst_131 = arith.constant dense<0.000000e+00> : vector<8xf32>
    %248 = vector.multi_reduction <add>, %247, %cst_131 [1] : vector<8x256xf32> to vector<8xf32>
    %249 = vector.shape_cast %248 : vector<8xf32> to vector<8x1xf32>
    %250 = arith.addf %246, %249 : vector<8x1xf32>
    %c0_132 = arith.constant 0 : index
    %c0_133 = arith.constant 0 : index
    %c0_134 = arith.constant 0 : index
    %251 = vector.load %arg10[%c0_132, %c0_133, %c0_134] : memref<1x8x1xf32, #tpu.memory_space<vmem>>, vector<1x8x1xf32>
    %252 = vector.shape_cast %251 : vector<1x8x1xf32> to vector<8x1xf32>
    %253 = vector.shape_cast %250 : vector<8x1xf32> to vector<1x8x1xf32>
    tpu.vector_store %arg10[%c0_132, %c0_133, %c0_134], %253 {strides = array<i32>} : memref<1x8x1xf32, #tpu.memory_space<vmem>>, vector<1x8x1xf32>,
    return
  }
  func.func @transform_0(%arg0: i32, %arg1: i32) -> (i32, i32, i32) {
    %c1_i32 = arith.constant 1 : i32
    %0 = arith.muli %arg0, %c1_i32 : i32
    %1 = arith.addi %0, %arg1 : i32
    %c0_i32 = arith.constant 0 : i32
    %c0_i32_0 = arith.constant 0 : i32
    %c0_i32_1 = arith.constant 0 : i32
    return %1, %c0_i32, %c0_i32_0 : i32, i32, i32
  }
  func.func @transform_1(%arg0: i32, %arg1: i32) -> (i32, i32) {
    %c0_i32 = arith.constant 0 : i32
    %c0_i32_0 = arith.constant 0 : i32
    %c0_i32_1 = arith.constant 0 : i32
    return %c0_i32, %c0_i32_0 : i32, i32
  }
  func.func @transform_2(%arg0: i32, %arg1: i32) -> (i32, i32) {
    %c0_i32 = arith.constant 0 : i32
    %c0_i32_0 = arith.constant 0 : i32
    %c0_i32_1 = arith.constant 0 : i32
    return %c0_i32, %c0_i32_0 : i32, i32
  }
  func.func @transform_3(%arg0: i32, %arg1: i32) -> (i32, i32) {
    %c0_i32 = arith.constant 0 : i32
    %c0_i32_0 = arith.constant 0 : i32
    %c0_i32_1 = arith.constant 0 : i32
    return %c0_i32, %c0_i32_0 : i32, i32
  }
  func.func @transform_4(%arg0: i32, %arg1: i32) -> (i32, i32) {
    %c0_i32 = arith.constant 0 : i32
    %c0_i32_0 = arith.constant 0 : i32
    %c0_i32_1 = arith.constant 0 : i32
    return %c0_i32, %c0_i32_0 : i32, i32
  }
  func.func @transform_5(%arg0: i32, %arg1: i32) -> (i32, i32) {
    %c0_i32 = arith.constant 0 : i32
    %c0_i32_0 = arith.constant 0 : i32
    %c0_i32_1 = arith.constant 0 : i32
    return %c0_i32, %c0_i32_0 : i32, i32
  }
  func.func @transform_6(%arg0: i32, %arg1: i32) -> (i32, i32, i32) {
    %c1_i32 = arith.constant 1 : i32
    %0 = arith.muli %arg0, %c1_i32 : i32
    %1 = arith.addi %0, %arg1 : i32
    %c0_i32 = arith.constant 0 : i32
    %c0_i32_0 = arith.constant 0 : i32
    %c0_i32_1 = arith.constant 0 : i32
    return %1, %c0_i32, %c0_i32_0 : i32, i32, i32
  }
  func.func @transform_7(%arg0: i32, %arg1: i32) -> (i32, i32, i32) {
    %c0_i32 = arith.constant 0 : i32
    %c0_i32_0 = arith.constant 0 : i32
    %c0_i32_1 = arith.constant 0 : i32
    return %arg0, %c0_i32, %c0_i32_0 : i32, i32, i32
  }
  func.func @transform_8(%arg0: i32, %arg1: i32) -> (i32, i32, i32) {
    %c0_i32 = arith.constant 0 : i32
    %c0_i32_0 = arith.constant 0 : i32
    %c0_i32_1 = arith.constant 0 : i32
    return %arg0, %c0_i32, %c0_i32_0 : i32, i32, i32
  }
}

module attributes {stable_mosaic.version = 11 : i64} {
  func.func @_conv_stats_kernel(%arg0: i32, %arg1: i32, %arg2: memref<2x4x256xbf16, #tpu.memory_space<vmem>>, %arg3: memref<8x36xbf16, #tpu.memory_space<vmem>>, %arg4: memref<2x8x256xbf16, #tpu.memory_space<vmem>>, %arg5: memref<1x8x1xf32, #tpu.memory_space<vmem>>, %arg6: memref<1x8x1xf32, #tpu.memory_space<vmem>>, %arg7: memref<36x256xbf16, #tpu.memory_space<vmem>>) attributes {dimension_semantics = [#tpu.dimension_semantics<parallel>, #tpu.dimension_semantics<arbitrary>], iteration_bounds = array<i64: 1, 1>, scalar_prefetch = 0 : i64, scratch_operands = 1 : i64, tpu.core_type = #tpu.core_type<tc>, window_params = [{transform_indices = @transform_0, window_bounds = array<i64: 2, 4, 256>}, {pipeline_mode = #tpu.pipeline_mode<synchronous>, transform_indices = @transform_1, window_bounds = array<i64: 8, 36>}, {transform_indices = @transform_2, window_bounds = array<i64: 2, 8, 256>}, {transform_indices = @transform_3, window_bounds = array<i64: 1, 8, 1>}, {transform_indices = @transform_4, window_bounds = array<i64: 1, 8, 1>}]} {
    %c0_i32 = arith.constant 0 : i32
    %0 = arith.cmpi eq, %arg1, %c0_i32 : i32
    %1 = arith.extui %0 : i1 to i32
    %c0_i32_0 = arith.constant 0 : i32
    %2 = arith.cmpi ne, %1, %c0_i32_0 : i32
    scf.if %2 {
      %cst_113 = arith.constant 0.000000e+00 : f32
      %204 = vector.broadcast %cst_113 : f32 to vector<8x1xf32>
      %c0_114 = arith.constant 0 : index
      %c0_115 = arith.constant 0 : index
      %c0_116 = arith.constant 0 : index
      %205 = vector.load %arg5[%c0_114, %c0_115, %c0_116] : memref<1x8x1xf32, #tpu.memory_space<vmem>>, vector<1x8x1xf32>
      %206 = vector.shape_cast %205 : vector<1x8x1xf32> to vector<8x1xf32>
      %207 = vector.shape_cast %204 : vector<8x1xf32> to vector<1x8x1xf32>
      tpu.vector_store %arg5[%c0_114, %c0_115, %c0_116], %207 {strides = array<i32>} : memref<1x8x1xf32, #tpu.memory_space<vmem>>, vector<1x8x1xf32>,
      %cst_117 = arith.constant 0.000000e+00 : f32
      %208 = vector.broadcast %cst_117 : f32 to vector<8x1xf32>
      %c0_118 = arith.constant 0 : index
      %c0_119 = arith.constant 0 : index
      %c0_120 = arith.constant 0 : index
      %209 = vector.load %arg6[%c0_118, %c0_119, %c0_120] : memref<1x8x1xf32, #tpu.memory_space<vmem>>, vector<1x8x1xf32>
      %210 = vector.shape_cast %209 : vector<1x8x1xf32> to vector<8x1xf32>
      %211 = vector.shape_cast %208 : vector<8x1xf32> to vector<1x8x1xf32>
      tpu.vector_store %arg6[%c0_118, %c0_119, %c0_120], %211 {strides = array<i32>} : memref<1x8x1xf32, #tpu.memory_space<vmem>>, vector<1x8x1xf32>,
    } else {
    }
    %3 = tpu.iota {dimensions = array<i32: 1>} : vector<1x256xi32>
    %c15_i32 = arith.constant 15 : i32
    %4 = vector.broadcast %c15_i32 : i32 to vector<1x256xi32>
    %5 = arith.andi %3, %4 : vector<1x256xi32>
    %c16_i32 = arith.constant 16 : i32
    %6 = vector.broadcast %c16_i32 : i32 to vector<1x256xi32>
    %7 = arith.cmpi sge, %3, %6 : vector<1x256xi32>
    %c1_i32 = arith.constant 1 : i32
    %8 = vector.broadcast %c1_i32 : i32 to vector<1x256xi32>
    %9 = arith.cmpi sge, %5, %8 : vector<1x256xi32>
    %10 = arith.andi %7, %9 : vector<1x256xi1>
    %c16_i32_1 = arith.constant 16 : i32
    %11 = vector.broadcast %c16_i32_1 : i32 to vector<1x256xi32>
    %12 = arith.cmpi sge, %3, %11 : vector<1x256xi32>
    %c16_i32_2 = arith.constant 16 : i32
    %13 = vector.broadcast %c16_i32_2 : i32 to vector<1x256xi32>
    %14 = arith.cmpi sge, %3, %13 : vector<1x256xi32>
    %c15_i32_3 = arith.constant 15 : i32
    %15 = vector.broadcast %c15_i32_3 : i32 to vector<1x256xi32>
    %16 = arith.cmpi slt, %5, %15 : vector<1x256xi32>
    %17 = arith.andi %14, %16 : vector<1x256xi1>
    %c1_i32_4 = arith.constant 1 : i32
    %18 = vector.broadcast %c1_i32_4 : i32 to vector<1x256xi32>
    %19 = arith.cmpi sge, %5, %18 : vector<1x256xi32>
    %c15_i32_5 = arith.constant 15 : i32
    %20 = vector.broadcast %c15_i32_5 : i32 to vector<1x256xi32>
    %21 = arith.cmpi slt, %5, %20 : vector<1x256xi32>
    %c240_i32 = arith.constant 240 : i32
    %22 = vector.broadcast %c240_i32 : i32 to vector<1x256xi32>
    %23 = arith.cmpi slt, %3, %22 : vector<1x256xi32>
    %c1_i32_6 = arith.constant 1 : i32
    %24 = vector.broadcast %c1_i32_6 : i32 to vector<1x256xi32>
    %25 = arith.cmpi sge, %5, %24 : vector<1x256xi32>
    %26 = arith.andi %23, %25 : vector<1x256xi1>
    %c240_i32_7 = arith.constant 240 : i32
    %27 = vector.broadcast %c240_i32_7 : i32 to vector<1x256xi32>
    %28 = arith.cmpi slt, %3, %27 : vector<1x256xi32>
    %c240_i32_8 = arith.constant 240 : i32
    %29 = vector.broadcast %c240_i32_8 : i32 to vector<1x256xi32>
    %30 = arith.cmpi slt, %3, %29 : vector<1x256xi32>
    %c15_i32_9 = arith.constant 15 : i32
    %31 = vector.broadcast %c15_i32_9 : i32 to vector<1x256xi32>
    %32 = arith.cmpi slt, %5, %31 : vector<1x256xi32>
    %33 = arith.andi %30, %32 : vector<1x256xi1>
    %c0 = arith.constant 0 : index
    %c0_10 = arith.constant 0 : index
    %c0_11 = arith.constant 0 : index
    %34 = vector.load %arg2[%c0, %c0_10, %c0_11] : memref<2x4x256xbf16, #tpu.memory_space<vmem>>, vector<1x4x256xbf16>
    %35 = vector.shape_cast %34 : vector<1x4x256xbf16> to vector<4x256xbf16>
    %36 = arith.extf %35 : vector<4x256xbf16> to vector<4x256xf32>
    %c17_i32 = arith.constant 17 : i32
    %37 = tpu.dynamic_rotate %36 by %c17_i32 dim 1 : vector<4x256xf32>, i32 -> vector<4x256xf32>
    %cst = arith.constant 0.000000e+00 : f32
    %38 = vector.shape_cast %10 : vector<1x256xi1> to vector<1x256xi1>
    %39 = vector.broadcast %38 : vector<1x256xi1> to vector<4x256xi1>
    %40 = vector.broadcast %cst : f32 to vector<4x256xf32>
    %41 = arith.select %39, %37, %40 : vector<4x256xi1>, vector<4x256xf32>
    %42 = arith.truncf %41 : vector<4x256xf32> to vector<4x256xbf16>
    %c0_12 = arith.constant 0 : index
    %c0_13 = arith.constant 0 : index
    %43 = vector.load %arg7[%c0_12, %c0_13] : memref<36x256xbf16, #tpu.memory_space<vmem>>, vector<4x256xbf16>
    tpu.vector_store %arg7[%c0_12, %c0_13], %42 {strides = array<i32>} : memref<36x256xbf16, #tpu.memory_space<vmem>>, vector<4x256xbf16>,
    %c16_i32_14 = arith.constant 16 : i32
    %44 = tpu.dynamic_rotate %36 by %c16_i32_14 dim 1 : vector<4x256xf32>, i32 -> vector<4x256xf32>
    %cst_15 = arith.constant 0.000000e+00 : f32
    %45 = vector.shape_cast %12 : vector<1x256xi1> to vector<1x256xi1>
    %46 = vector.broadcast %45 : vector<1x256xi1> to vector<4x256xi1>
    %47 = vector.broadcast %cst_15 : f32 to vector<4x256xf32>
    %48 = arith.select %46, %44, %47 : vector<4x256xi1>, vector<4x256xf32>
    %49 = arith.truncf %48 : vector<4x256xf32> to vector<4x256xbf16>
    %c4 = arith.constant 4 : index
    %c0_16 = arith.constant 0 : index
    %50 = vector.load %arg7[%c4, %c0_16] : memref<36x256xbf16, #tpu.memory_space<vmem>>, vector<4x256xbf16>
    tpu.vector_store %arg7[%c4, %c0_16], %49 {strides = array<i32>} : memref<36x256xbf16, #tpu.memory_space<vmem>>, vector<4x256xbf16>,
    %c15_i32_17 = arith.constant 15 : i32
    %51 = tpu.dynamic_rotate %36 by %c15_i32_17 dim 1 : vector<4x256xf32>, i32 -> vector<4x256xf32>
    %cst_18 = arith.constant 0.000000e+00 : f32
    %52 = vector.shape_cast %17 : vector<1x256xi1> to vector<1x256xi1>
    %53 = vector.broadcast %52 : vector<1x256xi1> to vector<4x256xi1>
    %54 = vector.broadcast %cst_18 : f32 to vector<4x256xf32>
    %55 = arith.select %53, %51, %54 : vector<4x256xi1>, vector<4x256xf32>
    %56 = arith.truncf %55 : vector<4x256xf32> to vector<4x256xbf16>
    %c8 = arith.constant 8 : index
    %c0_19 = arith.constant 0 : index
    %57 = vector.load %arg7[%c8, %c0_19] : memref<36x256xbf16, #tpu.memory_space<vmem>>, vector<4x256xbf16>
    tpu.vector_store %arg7[%c8, %c0_19], %56 {strides = array<i32>} : memref<36x256xbf16, #tpu.memory_space<vmem>>, vector<4x256xbf16>,
    %c1_i32_20 = arith.constant 1 : i32
    %58 = tpu.dynamic_rotate %36 by %c1_i32_20 dim 1 : vector<4x256xf32>, i32 -> vector<4x256xf32>
    %cst_21 = arith.constant 0.000000e+00 : f32
    %59 = vector.shape_cast %19 : vector<1x256xi1> to vector<1x256xi1>
    %60 = vector.broadcast %59 : vector<1x256xi1> to vector<4x256xi1>
    %61 = vector.broadcast %cst_21 : f32 to vector<4x256xf32>
    %62 = arith.select %60, %58, %61 : vector<4x256xi1>, vector<4x256xf32>
    %63 = arith.truncf %62 : vector<4x256xf32> to vector<4x256xbf16>
    %c12 = arith.constant 12 : index
    %c0_22 = arith.constant 0 : index
    %64 = vector.load %arg7[%c12, %c0_22] : memref<36x256xbf16, #tpu.memory_space<vmem>>, vector<4x256xbf16>
    tpu.vector_store %arg7[%c12, %c0_22], %63 {strides = array<i32>} : memref<36x256xbf16, #tpu.memory_space<vmem>>, vector<4x256xbf16>,
    %65 = arith.truncf %36 : vector<4x256xf32> to vector<4x256xbf16>
    %c16 = arith.constant 16 : index
    %c0_23 = arith.constant 0 : index
    %66 = vector.load %arg7[%c16, %c0_23] : memref<36x256xbf16, #tpu.memory_space<vmem>>, vector<4x256xbf16>
    tpu.vector_store %arg7[%c16, %c0_23], %65 {strides = array<i32>} : memref<36x256xbf16, #tpu.memory_space<vmem>>, vector<4x256xbf16>,
    %c255_i32 = arith.constant 255 : i32
    %67 = tpu.dynamic_rotate %36 by %c255_i32 dim 1 : vector<4x256xf32>, i32 -> vector<4x256xf32>
    %cst_24 = arith.constant 0.000000e+00 : f32
    %68 = vector.shape_cast %21 : vector<1x256xi1> to vector<1x256xi1>
    %69 = vector.broadcast %68 : vector<1x256xi1> to vector<4x256xi1>
    %70 = vector.broadcast %cst_24 : f32 to vector<4x256xf32>
    %71 = arith.select %69, %67, %70 : vector<4x256xi1>, vector<4x256xf32>
    %72 = arith.truncf %71 : vector<4x256xf32> to vector<4x256xbf16>
    %c20 = arith.constant 20 : index
    %c0_25 = arith.constant 0 : index
    %73 = vector.load %arg7[%c20, %c0_25] : memref<36x256xbf16, #tpu.memory_space<vmem>>, vector<4x256xbf16>
    tpu.vector_store %arg7[%c20, %c0_25], %72 {strides = array<i32>} : memref<36x256xbf16, #tpu.memory_space<vmem>>, vector<4x256xbf16>,
    %c241_i32 = arith.constant 241 : i32
    %74 = tpu.dynamic_rotate %36 by %c241_i32 dim 1 : vector<4x256xf32>, i32 -> vector<4x256xf32>
    %cst_26 = arith.constant 0.000000e+00 : f32
    %75 = vector.shape_cast %26 : vector<1x256xi1> to vector<1x256xi1>
    %76 = vector.broadcast %75 : vector<1x256xi1> to vector<4x256xi1>
    %77 = vector.broadcast %cst_26 : f32 to vector<4x256xf32>
    %78 = arith.select %76, %74, %77 : vector<4x256xi1>, vector<4x256xf32>
    %79 = arith.truncf %78 : vector<4x256xf32> to vector<4x256xbf16>
    %c24 = arith.constant 24 : index
    %c0_27 = arith.constant 0 : index
    %80 = vector.load %arg7[%c24, %c0_27] : memref<36x256xbf16, #tpu.memory_space<vmem>>, vector<4x256xbf16>
    tpu.vector_store %arg7[%c24, %c0_27], %79 {strides = array<i32>} : memref<36x256xbf16, #tpu.memory_space<vmem>>, vector<4x256xbf16>,
    %c240_i32_28 = arith.constant 240 : i32
    %81 = tpu.dynamic_rotate %36 by %c240_i32_28 dim 1 : vector<4x256xf32>, i32 -> vector<4x256xf32>
    %cst_29 = arith.constant 0.000000e+00 : f32
    %82 = vector.shape_cast %28 : vector<1x256xi1> to vector<1x256xi1>
    %83 = vector.broadcast %82 : vector<1x256xi1> to vector<4x256xi1>
    %84 = vector.broadcast %cst_29 : f32 to vector<4x256xf32>
    %85 = arith.select %83, %81, %84 : vector<4x256xi1>, vector<4x256xf32>
    %86 = arith.truncf %85 : vector<4x256xf32> to vector<4x256xbf16>
    %c28 = arith.constant 28 : index
    %c0_30 = arith.constant 0 : index
    %87 = vector.load %arg7[%c28, %c0_30] : memref<36x256xbf16, #tpu.memory_space<vmem>>, vector<4x256xbf16>
    tpu.vector_store %arg7[%c28, %c0_30], %86 {strides = array<i32>} : memref<36x256xbf16, #tpu.memory_space<vmem>>, vector<4x256xbf16>,
    %c239_i32 = arith.constant 239 : i32
    %88 = tpu.dynamic_rotate %36 by %c239_i32 dim 1 : vector<4x256xf32>, i32 -> vector<4x256xf32>
    %cst_31 = arith.constant 0.000000e+00 : f32
    %89 = vector.shape_cast %33 : vector<1x256xi1> to vector<1x256xi1>
    %90 = vector.broadcast %89 : vector<1x256xi1> to vector<4x256xi1>
    %91 = vector.broadcast %cst_31 : f32 to vector<4x256xf32>
    %92 = arith.select %90, %88, %91 : vector<4x256xi1>, vector<4x256xf32>
    %93 = arith.truncf %92 : vector<4x256xf32> to vector<4x256xbf16>
    %c32 = arith.constant 32 : index
    %c0_32 = arith.constant 0 : index
    %94 = vector.load %arg7[%c32, %c0_32] : memref<36x256xbf16, #tpu.memory_space<vmem>>, vector<4x256xbf16>
    tpu.vector_store %arg7[%c32, %c0_32], %93 {strides = array<i32>} : memref<36x256xbf16, #tpu.memory_space<vmem>>, vector<4x256xbf16>,
    %c0_33 = arith.constant 0 : index
    %c0_34 = arith.constant 0 : index
    %95 = vector.load %arg3[%c0_33, %c0_34] : memref<8x36xbf16, #tpu.memory_space<vmem>>, vector<8x36xbf16>
    %c0_35 = arith.constant 0 : index
    %c0_36 = arith.constant 0 : index
    %96 = vector.load %arg7[%c0_35, %c0_36] : memref<36x256xbf16, #tpu.memory_space<vmem>>, vector<36x256xbf16>
    %cst_37 = arith.constant dense<0.000000e+00> : vector<8x256xf32>
    %97 = tpu.matmul %95, %96, %cst_37 {dimension_numbers = #tpu.dot_dimension_numbers<[1], [0], [0], [1], [0, 0, 1, 1], [], []>} : vector<8x36xbf16>, vector<36x256xbf16>, vector<8x256xf32> -> vector<8x256xf32>
    %98 = arith.truncf %97 : vector<8x256xf32> to vector<8x256xbf16>
    %c0_38 = arith.constant 0 : index
    %c0_39 = arith.constant 0 : index
    %c0_40 = arith.constant 0 : index
    %99 = vector.load %arg4[%c0_38, %c0_39, %c0_40] : memref<2x8x256xbf16, #tpu.memory_space<vmem>>, vector<1x8x256xbf16>
    %100 = vector.shape_cast %99 : vector<1x8x256xbf16> to vector<8x256xbf16>
    %101 = vector.shape_cast %98 : vector<8x256xbf16> to vector<1x8x256xbf16>
    tpu.vector_store %arg4[%c0_38, %c0_39, %c0_40], %101 {strides = array<i32>} : memref<2x8x256xbf16, #tpu.memory_space<vmem>>, vector<1x8x256xbf16>,
    %c0_41 = arith.constant 0 : index
    %c0_42 = arith.constant 0 : index
    %c0_43 = arith.constant 0 : index
    %102 = vector.load %arg5[%c0_41, %c0_42, %c0_43] : memref<1x8x1xf32, #tpu.memory_space<vmem>>, vector<1x8x1xf32>
    %103 = vector.shape_cast %102 : vector<1x8x1xf32> to vector<8x1xf32>
    %cst_44 = arith.constant dense<0.000000e+00> : vector<8xf32>
    %104 = vector.multi_reduction <add>, %97, %cst_44 [1] : vector<8x256xf32> to vector<8xf32>
    %105 = vector.shape_cast %104 : vector<8xf32> to vector<8x1xf32>
    %106 = arith.addf %103, %105 : vector<8x1xf32>
    %c0_45 = arith.constant 0 : index
    %c0_46 = arith.constant 0 : index
    %c0_47 = arith.constant 0 : index
    %107 = vector.load %arg5[%c0_45, %c0_46, %c0_47] : memref<1x8x1xf32, #tpu.memory_space<vmem>>, vector<1x8x1xf32>
    %108 = vector.shape_cast %107 : vector<1x8x1xf32> to vector<8x1xf32>
    %109 = vector.shape_cast %106 : vector<8x1xf32> to vector<1x8x1xf32>
    tpu.vector_store %arg5[%c0_45, %c0_46, %c0_47], %109 {strides = array<i32>} : memref<1x8x1xf32, #tpu.memory_space<vmem>>, vector<1x8x1xf32>,
    %c0_48 = arith.constant 0 : index
    %c0_49 = arith.constant 0 : index
    %c0_50 = arith.constant 0 : index
    %110 = vector.load %arg6[%c0_48, %c0_49, %c0_50] : memref<1x8x1xf32, #tpu.memory_space<vmem>>, vector<1x8x1xf32>
    %111 = vector.shape_cast %110 : vector<1x8x1xf32> to vector<8x1xf32>
    %112 = arith.mulf %97, %97 : vector<8x256xf32>
    %cst_51 = arith.constant dense<0.000000e+00> : vector<8xf32>
    %113 = vector.multi_reduction <add>, %112, %cst_51 [1] : vector<8x256xf32> to vector<8xf32>
    %114 = vector.shape_cast %113 : vector<8xf32> to vector<8x1xf32>
    %115 = arith.addf %111, %114 : vector<8x1xf32>
    %c0_52 = arith.constant 0 : index
    %c0_53 = arith.constant 0 : index
    %c0_54 = arith.constant 0 : index
    %116 = vector.load %arg6[%c0_52, %c0_53, %c0_54] : memref<1x8x1xf32, #tpu.memory_space<vmem>>, vector<1x8x1xf32>
    %117 = vector.shape_cast %116 : vector<1x8x1xf32> to vector<8x1xf32>
    %118 = vector.shape_cast %115 : vector<8x1xf32> to vector<1x8x1xf32>
    tpu.vector_store %arg6[%c0_52, %c0_53, %c0_54], %118 {strides = array<i32>} : memref<1x8x1xf32, #tpu.memory_space<vmem>>, vector<1x8x1xf32>,
    %c1 = arith.constant 1 : index
    %c0_55 = arith.constant 0 : index
    %c0_56 = arith.constant 0 : index
    %119 = vector.load %arg2[%c1, %c0_55, %c0_56] : memref<2x4x256xbf16, #tpu.memory_space<vmem>>, vector<1x4x256xbf16>
    %120 = vector.shape_cast %119 : vector<1x4x256xbf16> to vector<4x256xbf16>
    %121 = arith.extf %120 : vector<4x256xbf16> to vector<4x256xf32>
    %c17_i32_57 = arith.constant 17 : i32
    %122 = tpu.dynamic_rotate %121 by %c17_i32_57 dim 1 : vector<4x256xf32>, i32 -> vector<4x256xf32>
    %cst_58 = arith.constant 0.000000e+00 : f32
    %123 = vector.shape_cast %10 : vector<1x256xi1> to vector<1x256xi1>
    %124 = vector.broadcast %123 : vector<1x256xi1> to vector<4x256xi1>
    %125 = vector.broadcast %cst_58 : f32 to vector<4x256xf32>
    %126 = arith.select %124, %122, %125 : vector<4x256xi1>, vector<4x256xf32>
    %127 = arith.truncf %126 : vector<4x256xf32> to vector<4x256xbf16>
    %c0_59 = arith.constant 0 : index
    %c0_60 = arith.constant 0 : index
    %128 = vector.load %arg7[%c0_59, %c0_60] : memref<36x256xbf16, #tpu.memory_space<vmem>>, vector<4x256xbf16>
    tpu.vector_store %arg7[%c0_59, %c0_60], %127 {strides = array<i32>} : memref<36x256xbf16, #tpu.memory_space<vmem>>, vector<4x256xbf16>,
    %c16_i32_61 = arith.constant 16 : i32
    %129 = tpu.dynamic_rotate %121 by %c16_i32_61 dim 1 : vector<4x256xf32>, i32 -> vector<4x256xf32>
    %cst_62 = arith.constant 0.000000e+00 : f32
    %130 = vector.shape_cast %12 : vector<1x256xi1> to vector<1x256xi1>
    %131 = vector.broadcast %130 : vector<1x256xi1> to vector<4x256xi1>
    %132 = vector.broadcast %cst_62 : f32 to vector<4x256xf32>
    %133 = arith.select %131, %129, %132 : vector<4x256xi1>, vector<4x256xf32>
    %134 = arith.truncf %133 : vector<4x256xf32> to vector<4x256xbf16>
    %c4_63 = arith.constant 4 : index
    %c0_64 = arith.constant 0 : index
    %135 = vector.load %arg7[%c4_63, %c0_64] : memref<36x256xbf16, #tpu.memory_space<vmem>>, vector<4x256xbf16>
    tpu.vector_store %arg7[%c4_63, %c0_64], %134 {strides = array<i32>} : memref<36x256xbf16, #tpu.memory_space<vmem>>, vector<4x256xbf16>,
    %c15_i32_65 = arith.constant 15 : i32
    %136 = tpu.dynamic_rotate %121 by %c15_i32_65 dim 1 : vector<4x256xf32>, i32 -> vector<4x256xf32>
    %cst_66 = arith.constant 0.000000e+00 : f32
    %137 = vector.shape_cast %17 : vector<1x256xi1> to vector<1x256xi1>
    %138 = vector.broadcast %137 : vector<1x256xi1> to vector<4x256xi1>
    %139 = vector.broadcast %cst_66 : f32 to vector<4x256xf32>
    %140 = arith.select %138, %136, %139 : vector<4x256xi1>, vector<4x256xf32>
    %141 = arith.truncf %140 : vector<4x256xf32> to vector<4x256xbf16>
    %c8_67 = arith.constant 8 : index
    %c0_68 = arith.constant 0 : index
    %142 = vector.load %arg7[%c8_67, %c0_68] : memref<36x256xbf16, #tpu.memory_space<vmem>>, vector<4x256xbf16>
    tpu.vector_store %arg7[%c8_67, %c0_68], %141 {strides = array<i32>} : memref<36x256xbf16, #tpu.memory_space<vmem>>, vector<4x256xbf16>,
    %c1_i32_69 = arith.constant 1 : i32
    %143 = tpu.dynamic_rotate %121 by %c1_i32_69 dim 1 : vector<4x256xf32>, i32 -> vector<4x256xf32>
    %cst_70 = arith.constant 0.000000e+00 : f32
    %144 = vector.shape_cast %19 : vector<1x256xi1> to vector<1x256xi1>
    %145 = vector.broadcast %144 : vector<1x256xi1> to vector<4x256xi1>
    %146 = vector.broadcast %cst_70 : f32 to vector<4x256xf32>
    %147 = arith.select %145, %143, %146 : vector<4x256xi1>, vector<4x256xf32>
    %148 = arith.truncf %147 : vector<4x256xf32> to vector<4x256xbf16>
    %c12_71 = arith.constant 12 : index
    %c0_72 = arith.constant 0 : index
    %149 = vector.load %arg7[%c12_71, %c0_72] : memref<36x256xbf16, #tpu.memory_space<vmem>>, vector<4x256xbf16>
    tpu.vector_store %arg7[%c12_71, %c0_72], %148 {strides = array<i32>} : memref<36x256xbf16, #tpu.memory_space<vmem>>, vector<4x256xbf16>,
    %150 = arith.truncf %121 : vector<4x256xf32> to vector<4x256xbf16>
    %c16_73 = arith.constant 16 : index
    %c0_74 = arith.constant 0 : index
    %151 = vector.load %arg7[%c16_73, %c0_74] : memref<36x256xbf16, #tpu.memory_space<vmem>>, vector<4x256xbf16>
    tpu.vector_store %arg7[%c16_73, %c0_74], %150 {strides = array<i32>} : memref<36x256xbf16, #tpu.memory_space<vmem>>, vector<4x256xbf16>,
    %c255_i32_75 = arith.constant 255 : i32
    %152 = tpu.dynamic_rotate %121 by %c255_i32_75 dim 1 : vector<4x256xf32>, i32 -> vector<4x256xf32>
    %cst_76 = arith.constant 0.000000e+00 : f32
    %153 = vector.shape_cast %21 : vector<1x256xi1> to vector<1x256xi1>
    %154 = vector.broadcast %153 : vector<1x256xi1> to vector<4x256xi1>
    %155 = vector.broadcast %cst_76 : f32 to vector<4x256xf32>
    %156 = arith.select %154, %152, %155 : vector<4x256xi1>, vector<4x256xf32>
    %157 = arith.truncf %156 : vector<4x256xf32> to vector<4x256xbf16>
    %c20_77 = arith.constant 20 : index
    %c0_78 = arith.constant 0 : index
    %158 = vector.load %arg7[%c20_77, %c0_78] : memref<36x256xbf16, #tpu.memory_space<vmem>>, vector<4x256xbf16>
    tpu.vector_store %arg7[%c20_77, %c0_78], %157 {strides = array<i32>} : memref<36x256xbf16, #tpu.memory_space<vmem>>, vector<4x256xbf16>,
    %c241_i32_79 = arith.constant 241 : i32
    %159 = tpu.dynamic_rotate %121 by %c241_i32_79 dim 1 : vector<4x256xf32>, i32 -> vector<4x256xf32>
    %cst_80 = arith.constant 0.000000e+00 : f32
    %160 = vector.shape_cast %26 : vector<1x256xi1> to vector<1x256xi1>
    %161 = vector.broadcast %160 : vector<1x256xi1> to vector<4x256xi1>
    %162 = vector.broadcast %cst_80 : f32 to vector<4x256xf32>
    %163 = arith.select %161, %159, %162 : vector<4x256xi1>, vector<4x256xf32>
    %164 = arith.truncf %163 : vector<4x256xf32> to vector<4x256xbf16>
    %c24_81 = arith.constant 24 : index
    %c0_82 = arith.constant 0 : index
    %165 = vector.load %arg7[%c24_81, %c0_82] : memref<36x256xbf16, #tpu.memory_space<vmem>>, vector<4x256xbf16>
    tpu.vector_store %arg7[%c24_81, %c0_82], %164 {strides = array<i32>} : memref<36x256xbf16, #tpu.memory_space<vmem>>, vector<4x256xbf16>,
    %c240_i32_83 = arith.constant 240 : i32
    %166 = tpu.dynamic_rotate %121 by %c240_i32_83 dim 1 : vector<4x256xf32>, i32 -> vector<4x256xf32>
    %cst_84 = arith.constant 0.000000e+00 : f32
    %167 = vector.shape_cast %28 : vector<1x256xi1> to vector<1x256xi1>
    %168 = vector.broadcast %167 : vector<1x256xi1> to vector<4x256xi1>
    %169 = vector.broadcast %cst_84 : f32 to vector<4x256xf32>
    %170 = arith.select %168, %166, %169 : vector<4x256xi1>, vector<4x256xf32>
    %171 = arith.truncf %170 : vector<4x256xf32> to vector<4x256xbf16>
    %c28_85 = arith.constant 28 : index
    %c0_86 = arith.constant 0 : index
    %172 = vector.load %arg7[%c28_85, %c0_86] : memref<36x256xbf16, #tpu.memory_space<vmem>>, vector<4x256xbf16>
    tpu.vector_store %arg7[%c28_85, %c0_86], %171 {strides = array<i32>} : memref<36x256xbf16, #tpu.memory_space<vmem>>, vector<4x256xbf16>,
    %c239_i32_87 = arith.constant 239 : i32
    %173 = tpu.dynamic_rotate %121 by %c239_i32_87 dim 1 : vector<4x256xf32>, i32 -> vector<4x256xf32>
    %cst_88 = arith.constant 0.000000e+00 : f32
    %174 = vector.shape_cast %33 : vector<1x256xi1> to vector<1x256xi1>
    %175 = vector.broadcast %174 : vector<1x256xi1> to vector<4x256xi1>
    %176 = vector.broadcast %cst_88 : f32 to vector<4x256xf32>
    %177 = arith.select %175, %173, %176 : vector<4x256xi1>, vector<4x256xf32>
    %178 = arith.truncf %177 : vector<4x256xf32> to vector<4x256xbf16>
    %c32_89 = arith.constant 32 : index
    %c0_90 = arith.constant 0 : index
    %179 = vector.load %arg7[%c32_89, %c0_90] : memref<36x256xbf16, #tpu.memory_space<vmem>>, vector<4x256xbf16>
    tpu.vector_store %arg7[%c32_89, %c0_90], %178 {strides = array<i32>} : memref<36x256xbf16, #tpu.memory_space<vmem>>, vector<4x256xbf16>,
    %c0_91 = arith.constant 0 : index
    %c0_92 = arith.constant 0 : index
    %180 = vector.load %arg3[%c0_91, %c0_92] : memref<8x36xbf16, #tpu.memory_space<vmem>>, vector<8x36xbf16>
    %c0_93 = arith.constant 0 : index
    %c0_94 = arith.constant 0 : index
    %181 = vector.load %arg7[%c0_93, %c0_94] : memref<36x256xbf16, #tpu.memory_space<vmem>>, vector<36x256xbf16>
    %cst_95 = arith.constant dense<0.000000e+00> : vector<8x256xf32>
    %182 = tpu.matmul %180, %181, %cst_95 {dimension_numbers = #tpu.dot_dimension_numbers<[1], [0], [0], [1], [0, 0, 1, 1], [], []>} : vector<8x36xbf16>, vector<36x256xbf16>, vector<8x256xf32> -> vector<8x256xf32>
    %183 = arith.truncf %182 : vector<8x256xf32> to vector<8x256xbf16>
    %c1_96 = arith.constant 1 : index
    %c0_97 = arith.constant 0 : index
    %c0_98 = arith.constant 0 : index
    %184 = vector.load %arg4[%c1_96, %c0_97, %c0_98] : memref<2x8x256xbf16, #tpu.memory_space<vmem>>, vector<1x8x256xbf16>
    %185 = vector.shape_cast %184 : vector<1x8x256xbf16> to vector<8x256xbf16>
    %186 = vector.shape_cast %183 : vector<8x256xbf16> to vector<1x8x256xbf16>
    tpu.vector_store %arg4[%c1_96, %c0_97, %c0_98], %186 {strides = array<i32>} : memref<2x8x256xbf16, #tpu.memory_space<vmem>>, vector<1x8x256xbf16>,
    %c0_99 = arith.constant 0 : index
    %c0_100 = arith.constant 0 : index
    %c0_101 = arith.constant 0 : index
    %187 = vector.load %arg5[%c0_99, %c0_100, %c0_101] : memref<1x8x1xf32, #tpu.memory_space<vmem>>, vector<1x8x1xf32>
    %188 = vector.shape_cast %187 : vector<1x8x1xf32> to vector<8x1xf32>
    %cst_102 = arith.constant dense<0.000000e+00> : vector<8xf32>
    %189 = vector.multi_reduction <add>, %182, %cst_102 [1] : vector<8x256xf32> to vector<8xf32>
    %190 = vector.shape_cast %189 : vector<8xf32> to vector<8x1xf32>
    %191 = arith.addf %188, %190 : vector<8x1xf32>
    %c0_103 = arith.constant 0 : index
    %c0_104 = arith.constant 0 : index
    %c0_105 = arith.constant 0 : index
    %192 = vector.load %arg5[%c0_103, %c0_104, %c0_105] : memref<1x8x1xf32, #tpu.memory_space<vmem>>, vector<1x8x1xf32>
    %193 = vector.shape_cast %192 : vector<1x8x1xf32> to vector<8x1xf32>
    %194 = vector.shape_cast %191 : vector<8x1xf32> to vector<1x8x1xf32>
    tpu.vector_store %arg5[%c0_103, %c0_104, %c0_105], %194 {strides = array<i32>} : memref<1x8x1xf32, #tpu.memory_space<vmem>>, vector<1x8x1xf32>,
    %c0_106 = arith.constant 0 : index
    %c0_107 = arith.constant 0 : index
    %c0_108 = arith.constant 0 : index
    %195 = vector.load %arg6[%c0_106, %c0_107, %c0_108] : memref<1x8x1xf32, #tpu.memory_space<vmem>>, vector<1x8x1xf32>
    %196 = vector.shape_cast %195 : vector<1x8x1xf32> to vector<8x1xf32>
    %197 = arith.mulf %182, %182 : vector<8x256xf32>
    %cst_109 = arith.constant dense<0.000000e+00> : vector<8xf32>
    %198 = vector.multi_reduction <add>, %197, %cst_109 [1] : vector<8x256xf32> to vector<8xf32>
    %199 = vector.shape_cast %198 : vector<8xf32> to vector<8x1xf32>
    %200 = arith.addf %196, %199 : vector<8x1xf32>
    %c0_110 = arith.constant 0 : index
    %c0_111 = arith.constant 0 : index
    %c0_112 = arith.constant 0 : index
    %201 = vector.load %arg6[%c0_110, %c0_111, %c0_112] : memref<1x8x1xf32, #tpu.memory_space<vmem>>, vector<1x8x1xf32>
    %202 = vector.shape_cast %201 : vector<1x8x1xf32> to vector<8x1xf32>
    %203 = vector.shape_cast %200 : vector<8x1xf32> to vector<1x8x1xf32>
    tpu.vector_store %arg6[%c0_110, %c0_111, %c0_112], %203 {strides = array<i32>} : memref<1x8x1xf32, #tpu.memory_space<vmem>>, vector<1x8x1xf32>,
    return
  }
  func.func @transform_0(%arg0: i32, %arg1: i32) -> (i32, i32, i32) {
    %c1_i32 = arith.constant 1 : i32
    %0 = arith.muli %arg0, %c1_i32 : i32
    %1 = arith.addi %0, %arg1 : i32
    %c0_i32 = arith.constant 0 : i32
    %c0_i32_0 = arith.constant 0 : i32
    %c0_i32_1 = arith.constant 0 : i32
    return %1, %c0_i32, %c0_i32_0 : i32, i32, i32
  }
  func.func @transform_1(%arg0: i32, %arg1: i32) -> (i32, i32) {
    %c0_i32 = arith.constant 0 : i32
    %c0_i32_0 = arith.constant 0 : i32
    %c0_i32_1 = arith.constant 0 : i32
    return %c0_i32, %c0_i32_0 : i32, i32
  }
  func.func @transform_2(%arg0: i32, %arg1: i32) -> (i32, i32, i32) {
    %c1_i32 = arith.constant 1 : i32
    %0 = arith.muli %arg0, %c1_i32 : i32
    %1 = arith.addi %0, %arg1 : i32
    %c0_i32 = arith.constant 0 : i32
    %c0_i32_0 = arith.constant 0 : i32
    %c0_i32_1 = arith.constant 0 : i32
    return %1, %c0_i32, %c0_i32_0 : i32, i32, i32
  }
  func.func @transform_3(%arg0: i32, %arg1: i32) -> (i32, i32, i32) {
    %c0_i32 = arith.constant 0 : i32
    %c0_i32_0 = arith.constant 0 : i32
    %c0_i32_1 = arith.constant 0 : i32
    return %arg0, %c0_i32, %c0_i32_0 : i32, i32, i32
  }
  func.func @transform_4(%arg0: i32, %arg1: i32) -> (i32, i32, i32) {
    %c0_i32 = arith.constant 0 : i32
    %c0_i32_0 = arith.constant 0 : i32
    %c0_i32_1 = arith.constant 0 : i32
    return %arg0, %c0_i32, %c0_i32_0 : i32, i32, i32
  }
}

</mosaic_0001>

<bundles_post_ra>
// kernel: vgg_block_forward.5
= control target key start
LH: loop header
LB: loop body
LE: loop exit
PB: predicated region body
PF: predicated region fallthrough
CT: control target
= control target key end

     0   :  { %v119_v0 = vmov 0   ;;  %s180_s1 = inlined_call_operand.vmem [shape: f32[8,1], index: 1, kind: input, shape index: {}]   ;;  %s181_s2 = inlined_call_operand.vmem [shape: f32[8,1], index: 2, kind: input, shape index: {}]   ;;  %s182_s3 = inlined_call_operand.vmem [shape: f32[8,1], index: 3, kind: input, shape index: {}]   ;;  %s183_s4 = inlined_call_operand.vmem [shape: f32[8,1], index: 4, kind: input, shape index: {}]   ;;  %s184_s0 = inlined_call_operand.vmem [shape: bf16[2,8,256], index: 0, kind: input, shape index: {}]   ;;  %s185_s5 = inlined_call_operand.vmem [shape: f32[2,8,256], index: 5, kind: output, shape index: {}]  }
   0x1   :  { %108 = vset.pattern.permute.xlu0 %v119_v0  ;;  %v20_v1 = vld [vmem:[%s180_s1] sm:$0xff]  ;;  %v102_v16 = vld [vmem:[%s184_s0 + $0x8] sm:$0xff] }
   0x2   :  { %v21_v2 = vld [vmem:[%s181_s2] sm:$0xff]  ;;  %v24_v3 = vmul.f32 0.001953125, %v20_v1  ;;  %v71_v19 = vunpack.c.l.bf16 %v102_v16  ;;  %v72_v20 = vunpack.c.h.bf16 %v102_v16 }
   0x3   :  { %v25_v4 = vmul.f32 0.001953125, %v21_v2  ;;  %v22_v9 = vld [vmem:[%s182_s3] sm:$0xff] }
   0x4   :  { %v26_v5 = vmul.f32 %v24_v3, %v24_v3  ;;  %v23_v12 = vld [vmem:[%s183_s4] sm:$0xff] }
   0x5   :  { %v34_v15 = vld [vmem:[%s184_s0] sm:$0xff] }
   0x6   :  { %v27_v6 = vsub.f32 %v25_v4, %v26_v5  ;;  %v35_v17 = vunpack.c.l.bf16 %v34_v15  ;;  %v36_v18 = vunpack.c.h.bf16 %v34_v15 }
   0x8   :  { %v28_v7 = vmax.f32 %v27_v6, 0.0 }
   0xa   :  { %v29_v8 = vadd.f32 1e-05, %v28_v7 }
   0xc   :  { %109 = vrsqrt.f32 %v29_v8 }
  0x16   :  { %v110_v10 = vpop.eup %109 }
  0x17   :  { %v31_v11 = vmul.f32 %v110_v10, %v22_v9 }
  0x19   :  { %39 = vperm.xlu0 %108, %v31_v11   ;;  %v32_v13 = vmul.f32 %v31_v11, %v24_v3 }
  0x1b   :  { %v33_v14 = vsub.f32 %v23_v12, %v32_v13 }
  0x1d   :  { %46 = vperm.xlu0 %108, %v33_v14  }
  0x98   :  { %v40_v21 = vpop.permute.xlu0 %39 }
  0x99   :  { %v42_v22 = vmul.f32 %v40_v21, %v35_v17  ;;  %v43_v23 = vmul.f32 %v40_v21, %v36_v18  ;;  %v73_v24 = vmul.f32 %v71_v19, %v40_v21  ;;  %v74_v25 = vmul.f32 %v72_v20, %v40_v21 }
  0x9c   :  { %v47_v26 = vpop.permute.xlu0 %46 }
  0x9d   :  { %v49_v27 = vadd.f32 %v47_v26, %v42_v22  ;;  %v50_v28 = vadd.f32 %v47_v26, %v43_v23  ;;  %v75_v29 = vadd.f32 %v73_v24, %v47_v26  ;;  %v76_v30 = vadd.f32 %v74_v25, %v47_v26 }
  0x9f   :  { %v51_v31 = vmin.f32 %v49_v27, 0.0  ;;  %v52_v32 = vmin.f32 %v50_v28, 0.0  ;;  %v77_v33 = vmin.f32 %v75_v29, 0.0  ;;  %v78_v34 = vmin.f32 %v76_v30, 0.0 }
  0xa0   :  { %vm61_vm0 = vcmp.gt.f32.partialorder %v49_v27, 0.0  ;;  %vm62_vm1 = vcmp.gt.f32.partialorder %v50_v28, 0.0  ;;  %vm87_vm2 = vcmp.gt.f32.partialorder %v75_v29, 0.0  ;;  %vm88_vm3 = vcmp.gt.f32.partialorder %v76_v30, 0.0 }
  0xa1   :  { %v53_v35 = vmul.f32 1.442695, %v51_v31  ;;  %v55_v36 = vmul.f32 1.442695, %v52_v32  ;;  %v79_v37 = vmul.f32 1.442695, %v77_v33 }
  0xa2   :  { %v81_v38 = vmul.f32 1.442695, %v78_v34 }
  0xa3   :  { %111 = vpow2.f32 %v53_v35 }
  0xa4   :  { %113 = vpow2.f32 %v55_v36 }
  0xa5   :  { %115 = vpow2.f32 %v79_v37 }
  0xa6   :  { %117 = vpow2.f32 %v81_v38 }
  0xad   :  { %v112_v39 = vpop.eup %111 }
  0xae   :  { %v114_v40 = vpop.eup %113  ;;  %v100_v41 = vadd.f32 -1.0, %v112_v39 }
  0xaf   :  { %v116_v42 = vpop.eup %115  ;;  %v101_v43 = vadd.f32 -1.0, %v114_v40 }
  0xb0   :  { %v118_v44 = vpop.eup %117  ;;  %v59_v45 = vmul.f32 1.6732632, %v100_v41  ;;  %v103_v46 = vadd.f32 -1.0, %v116_v42 }
  0xb1   :  { %v60_v47 = vmul.f32 1.6732632, %v101_v43  ;;  %v104_v48 = vadd.f32 -1.0, %v118_v44 }
  0xb2   :  { %v63_v49 = vsel %vm61_vm0, %v49_v27, %v59_v45  ;;  %v85_v50 = vmul.f32 1.6732632, %v103_v46 }
  0xb3   :  { %v64_v51 = vsel %vm62_vm1, %v50_v28, %v60_v47  ;;  %v65_v52 = vmul.f32 1.050701, %v63_v49  ;;  %v86_v53 = vmul.f32 1.6732632, %v104_v48 }
  0xb4   :  { %v66_v54 = vmul.f32 1.050701, %v64_v51  ;;  %v89_v55 = vsel %vm87_vm2, %v75_v29, %v85_v50 }
  0xb5   :  { %67 = vst [vmem:[%s185_s5] sm:$0xff] %v65_v52  ;;  %v90_v56 = vsel %vm88_vm3, %v76_v30, %v86_v53  ;;  %v91_v57 = vmul.f32 1.050701, %v89_v55 }
  0xb6   :  { %68 = vst [vmem:[%s185_s5 + $0x8] sm:$0xff] %v66_v54  ;;  %v92_v58 = vmul.f32 1.050701, %v90_v56 }
  0xb7   :  { %105 = vst [vmem:[%s185_s5 + $0x10] sm:$0xff] %v91_v57 }
  0xb8   :  { %106 = vst [vmem:[%s185_s5 + $0x18] sm:$0xff] %v92_v58 }

// kernel: vgg_block_forward.3
= control target key start
LH: loop header
LB: loop body
LE: loop exit
PB: predicated region body
PF: predicated region fallthrough
CT: control target
= control target key end

     0   :  { %s848_s17 = smov 17   ;;  %s849_s18 = smov 16   ;;  %v856_v8 = vmov 0   ;;  %v63_v9 = vlaneseq  ;;  %s1130_s0 = inlined_call_operand.vmem [shape: bf16[2,4,256], index: 0, kind: input, shape index: {}]   ;;  %s1131_s1 = inlined_call_operand.vmem [shape: bf16[8,36], index: 1, kind: input, shape index: {}]   ;;  %s1132_s3 = inlined_call_operand.vmem [shape: f32[1,8,1], index: 3, kind: output, shape index: {1}]   ;;  %s1133_s2 = inlined_call_operand.vmem [shape: bf16[2,8,256], index: 2, kind: output, shape index: {0}]   ;;  %s1134_s4 = inlined_call_operand.vmem [shape: f32[1,8,1], index: 4, kind: output, shape index: {2}]  }
   0x1   :  { %v84_v0 = vld [vmem:[%s1130_s0] sm:$0xf]  ;;  %v889_v4 = vld [vmem:[%s1130_s0 + $0x4] sm:$0xf]  ;;  %s850_s21 = smov 15   ;;  %s851_s22 = smov 1   ;;  %353 = vmatprep.mubr.bf16.mxu0 %v856_v8  ;;  %614 = vmatprep.mubr.bf16.mxu1 %v856_v8 }
   0x2   :  { %v85_v1 = vunpack.c.l.bf16 %v84_v0  ;;  %693 = vst.sshfl [vmem:[#allocation2 + $0x10] sm:$0xf pattern:$0x76325410] %v84_v0  ;;  %v388_v5 = vunpack.c.l.bf16 %v889_v4  ;;  %s852_s23 = smov 112   ;;  %s853_s24 = smov 127  }
   0x3   :  { %s854_s25 = smov 111   ;;  %s855_s26 = smov 113   ;;  %v892_v10 = vand.u32 127, %v63_v9 }
   0x4   :  { %v87_v2 = vcombine.high %v85_v1, %v85_v1  ;;  %v390_v6 = vcombine.high %v388_v5, %v388_v5 }
   0x5   :  { %v895_v11 = vadd.s32 128, %v892_v10  ;;  %v66_v12 = vand.u32 15, %v892_v10  ;;  %vm68_vm0 = vcmp.ge.s32.totalorder %v892_v10, 16  ;;  %vm93_vm3 = vcmp.lt.s32.totalorder %v892_v10, 17 }
   0x6   :  { %v765_v3 = vpack.i.bf16 %v87_v2, %v85_v1  ;;  %v800_v7 = vpack.i.bf16 %v390_v6, %v388_v5  ;;  %vm115_vm4 = vcmp.lt.s32.totalorder %v892_v10, 16  ;;  %vm138_vm8 = vcmp.lt.s32.totalorder %v892_v10, 15 }
   0x7   :  { %v67_v13 = vand.u32 15, %v895_v11  ;;  %vm900_vm1 = vcmp.ge.s32.totalorder %v66_v12, 1  ;;  %vm918_vm6 = vcmp.lt.s32.totalorder %v66_v12, 15  ;;  %vm160_vm9 = vcmp.lt.s32.totalorder %v892_v10, 1 }
   0x8   :  { %766 = vrot.lane.b32.xlu1 %v765_v3, %s848_s17  ;;  %756 = vrot.lane.b32.xlu0 %v765_v3, %s849_s18  ;;  %vm914_vm5 = vmand %vm68_vm0, %vm900_vm1  ;;  %vm79_vm11 = vcmp.lt.s32.totalorder %v895_v11, 240  ;;  %vm1135_vm12 = vcmp.lt.s32.totalorder %v892_v10, 112  ;;  %vm1136_vm13 = vcmp.lt.s32.totalorder %v892_v10, 127  ;;  %vm261_vm14 = vcmp.lt.s32.totalorder %v892_v10, 111 }
   0x9   :  { %vm904_vm2 = vcmp.ge.s32.totalorder %v67_v13, 1  ;;  %vm922_vm7 = vcmp.lt.s32.totalorder %v67_v13, 15  ;;  %vm946_vm10 = vmand %vm68_vm0, %vm918_vm6  ;;  %vm216_vm15 = vcmp.lt.s32.totalorder %v892_v10, 113 }
   0xc   :  { %771 = vrot.lane.b32.xlu1 %v765_v3, %s850_s21  ;;  %761 = vrot.lane.b32.xlu0 %v765_v3, %s851_s22 }
  0x10   :  { %781 = vrot.lane.b32.xlu1 %v765_v3, %s852_s23  ;;  %776 = vrot.lane.b32.xlu0 %v765_v3, %s853_s24 }
  0x14   :  { %791 = vrot.lane.b32.xlu1 %v765_v3, %s854_s25  ;;  %786 = vrot.lane.b32.xlu0 %v765_v3, %s855_s26 }
  0x18   :  { %801 = vrot.lane.b32.xlu1 %v800_v7, %s851_s22  ;;  %796 = vrot.lane.b32.xlu0 %v800_v7, %s849_s18 }
  0x1c   :  { %811 = vrot.lane.b32.xlu1 %v800_v7, %s850_s21  ;;  %806 = vrot.lane.b32.xlu0 %v800_v7, %s848_s17 }
  0x20   :  { %816 = vrot.lane.b32.xlu0 %v800_v7, %s853_s24  ;;  %821 = vrot.lane.b32.xlu1 %v800_v7, %s852_s23 }
  0x24   :  { %826 = vrot.lane.b32.xlu0 %v800_v7, %s855_s26  ;;  %831 = vrot.lane.b32.xlu1 %v800_v7, %s854_s25 }
  0x7a   :  { %v767_v16 = vpop.permute.xlu1 %766  ;;  %v757_v17 = vpop.permute.xlu0 %756 }
  0x7b   :  { %v769_v19 = vunpack.i.h.bf16 %v767_v16  ;;  %v768_v20 = vunpack.i.l.bf16 %v767_v16  ;;  %v759_v21 = vunpack.i.h.bf16 %v757_v17  ;;  %v758_v22 = vunpack.i.l.bf16 %v757_v17 }
  0x7d   :  { %v94_v25 = vsel %vm93_vm3, %v768_v20, %v769_v19  ;;  %v95_v26 = vsel %vm93_vm3, %v769_v19, %v768_v20  ;;  %v116_v27 = vsel %vm115_vm4, %v758_v22, %v759_v21  ;;  %v117_v28 = vsel %vm115_vm4, %v759_v21, %v758_v22 }
  0x7e   :  { %v100_v29 = vsel %vm914_vm5, %v95_v26, 0.0  ;;  %v101_v30 = vsel %vm904_vm2, %v94_v25, 0.0  ;;  %v122_v31 = vsel %vm68_vm0, %v117_v28, 0.0  ;;  %v772_v32 = vpop.permute.xlu1 %771  ;;  %v762_v33 = vpop.permute.xlu0 %761 }
  0x7f   :  { %v727_v34 = vpack.c.bf16 %v101_v30, %v100_v29  ;;  %v728_v35 = vpack.c.bf16 %v116_v27, %v122_v31  ;;  %v774_v37 = vunpack.i.h.bf16 %v772_v32  ;;  %v773_v38 = vunpack.i.l.bf16 %v772_v32 }
  0x80   :  { %v764_v39 = vunpack.i.h.bf16 %v762_v33  ;;  %v763_v40 = vunpack.i.l.bf16 %v762_v33 }
  0x81   :  { %110 = vst [vmem:[#allocation2] sm:$0x33] %v727_v34  ;;  %v131_v41 = vrot.slane %v728_v35, 6  ;;  %v139_v42 = vsel %vm138_vm8, %v773_v38, %v774_v37  ;;  %v140_v43 = vsel %vm138_vm8, %v774_v37, %v773_v38 }
  0x82   :  { %v145_v44 = vsel %vm946_vm10, %v140_v43, 0.0  ;;  %v146_v45 = vsel %vm922_vm7, %v139_v42, 0.0  ;;  %v161_v46 = vsel %vm160_vm9, %v763_v40, %v764_v39  ;;  %v162_v47 = vsel %vm160_vm9, %v764_v39, %v763_v40  ;;  %v782_v48 = vpop.permute.xlu1 %781  ;;  %v777_v49 = vpop.permute.xlu0 %776 }
  0x83   :  { %133 = vst [vmem:[#allocation2] sm:$0xcc] %v131_v41  ;;  %v729_v50 = vpack.c.bf16 %v146_v45, %v145_v44  ;;  %v167_v51 = vsel %vm900_vm1, %v162_v47, 0.0  ;;  %v168_v52 = vsel %vm904_vm2, %v161_v46, 0.0  ;;  %v784_v53 = vunpack.i.h.bf16 %v782_v48 }
  0x84   :  { %v730_v54 = vpack.c.bf16 %v168_v52, %v167_v51  ;;  %v783_v55 = vunpack.i.l.bf16 %v782_v48  ;;  %v779_v56 = vunpack.i.h.bf16 %v777_v49  ;;  %v778_v57 = vunpack.i.l.bf16 %v777_v49 }
  0x85   :  { %155 = vst [vmem:[#allocation2 + $0x8] sm:$0x33] %v729_v50 }
  0x86   :  { %v176_v58 = vrot.slane %v730_v54, 6  ;;  %v239_v59 = vsel %vm1135_vm12, %v783_v55, %v784_v53  ;;  %v240_v60 = vsel %vm1135_vm12, %v784_v53, %v783_v55  ;;  %v194_v61 = vsel %vm1136_vm13, %v778_v57, %v779_v56  ;;  %v792_v62 = vpop.permute.xlu1 %791  ;;  %v787_v63 = vpop.permute.xlu0 %786  ;;  %vm989_vm12 = vmand %vm79_vm11, %vm922_vm7 }
  0x87   :  { %v246_v0 = vsel %vm79_vm11, %v240_v60, 0.0  ;;  %v195_v1 = vsel %vm1136_vm13, %v779_v56, %v778_v57  ;;  %v200_v2 = vsel %vm918_vm6, %v194_v61, 0.0  ;;  %v794_v3 = vunpack.i.h.bf16 %v792_v62  ;;  %vm1001_vm13 = vmand %vm79_vm11, %vm904_vm2 }
  0x88   :  { %178 = vst [vmem:[#allocation2 + $0x8] sm:$0xcc] %v176_v58  ;;  %v733_v5 = vpack.c.bf16 %v246_v0, %v239_v59  ;;  %v201_v6 = vsel %vm922_vm7, %v195_v1, 0.0  ;;  %v793_v8 = vunpack.i.l.bf16 %v792_v62  ;;  %v789_v9 = vunpack.i.h.bf16 %v787_v63 }
  0x89   :  { %v731_v12 = vpack.c.bf16 %v201_v6, %v200_v2  ;;  %v788_v13 = vunpack.i.l.bf16 %v787_v63 }
  0x8a   :  { %v254_v16 = vrot.slane %v733_v5, 6  ;;  %v262_v17 = vsel %vm261_vm14, %v793_v8, %v794_v3  ;;  %v263_v19 = vsel %vm261_vm14, %v794_v3, %v793_v8  ;;  %v802_v21 = vpop.permute.xlu1 %801  ;;  %v797_v22 = vpop.permute.xlu0 %796  ;;  %v280_v55 = vld [vmem:[#allocation2] sm:$0xff] }
  0x8b   :  { %v209_v25 = vrot.slane %v731_v12, 6  ;;  %v268_v26 = vsel %vm918_vm6, %v262_v17, 0.0  ;;  %v269_v27 = vsel %vm989_vm12, %v263_v19, 0.0  ;;  %v217_v28 = vsel %vm216_vm15, %v788_v13, %v789_v9 }
  0x8c   :  { %256 = vst [vmem:[#allocation2 + $0x18] sm:$0xcc] %v254_v16  ;;  %v734_v29 = vpack.c.bf16 %v269_v27, %v268_v26  ;;  %v218_v30 = vsel %vm216_vm15, %v789_v9, %v788_v13  ;;  %v223_v31 = vsel %vm900_vm1, %v217_v28, 0.0  ;;  %v804_v32 = vunpack.i.h.bf16 %v802_v21 }
  0x8d   :  { %211 = vst [vmem:[#allocation2 + $0x10] sm:$0xcc] %v209_v25  ;;  %v224_v33 = vsel %vm1001_vm13, %v218_v30, 0.0  ;;  %v803_v34 = vunpack.i.l.bf16 %v802_v21  ;;  %v799_v35 = vunpack.i.h.bf16 %v797_v22  ;;  %v798_v37 = vunpack.i.l.bf16 %v797_v22 }
  0x8e   :  { %278 = vst [vmem:[#allocation2 + $0x20] sm:$0x33] %v734_v29  ;;  %v732_v38 = vpack.c.bf16 %v224_v33, %v223_v31  ;;  %v812_v39 = vpop.permute.xlu1 %811  ;;  %v807_v40 = vpop.permute.xlu0 %806 }
  0x8f   :  { %v448_v41 = vsel %vm160_vm9, %v803_v34, %v804_v32  ;;  %v449_v42 = vsel %vm160_vm9, %v804_v32, %v803_v34  ;;  %v413_v43 = vsel %vm115_vm4, %v798_v37, %v799_v35  ;;  %v414_v44 = vsel %vm115_vm4, %v799_v35, %v798_v37  ;;  %v281_v45 = vld [vmem:[#allocation2 + $0x8] sm:$0xff] }
  0x90   :  { %v835_v46 = vld [vmem:[#allocation2 + $0x4] ss:$8 sps:$4 sm:$0xff]   ;;  %233 = vst [vmem:[#allocation2 + $0x18] sm:$0x33] %v732_v38  ;;  %v450_v47 = vsel %vm900_vm1, %v449_v42, 0.0  ;;  %v451_v48 = vsel %vm904_vm2, %v448_v41, 0.0  ;;  %v814_v50 = vunpack.i.h.bf16 %v812_v39  ;;  %v813_v53 = vunpack.i.l.bf16 %v812_v39 }
  0x91   :  { %v415_v49 = vsel %vm68_vm0, %v414_v44, 0.0  ;;  %v739_v51 = vpack.c.bf16 %v451_v48, %v450_v47  ;;  %v809_v54 = vunpack.i.h.bf16 %v807_v40  ;;  %321 = vmatprep.subr.bf16.mxu0 %v835_v46  ;;  %v808_v56 = vunpack.i.l.bf16 %v807_v40 }
  0x92   :  { %v737_v52 = vpack.c.bf16 %v413_v43, %v415_v49  ;;  %v817_v57 = vpop.permute.xlu0 %816  ;;  %v698_v58 = vcombine.low %v280_v55, %v281_v45  ;;  %v822_v59 = vpop.permute.xlu1 %821  ;;  %v431_v62 = vsel %vm138_vm8, %v813_v53, %v814_v50  ;;  %v432_v63 = vsel %vm138_vm8, %v814_v50, %v813_v53 }
  0x93   :  { %v459_v60 = vrot.slane %v739_v51, 6  ;;  %vm314_vm0 = vcmask 1041408   ;;  %v433_v0 = vsel %vm946_vm10, %v432_v63, 0.0  ;;  %v434_v1 = vsel %vm922_vm7, %v431_v62, 0.0 }
  0x94   :  { %v424_v61 = vrot.slane %v737_v52, 6  ;;  %v396_v2 = vsel %vm93_vm3, %v808_v56, %v809_v54  ;;  %v397_v3 = vsel %vm93_vm3, %v809_v54, %v808_v56  ;;  %322 = vmatpush1.bf16.msra.mxu0 %v698_v58  ;;  %v738_v5 = vpack.c.bf16 %v434_v1, %v433_v0  ;;  %v542_v56 = vld [vmem:[%s1131_s1] sm:$0xf] }
  0x95   :  { %v398_v6 = vsel %vm914_vm5, %v397_v3, 0.0  ;;  %v399_v8 = vsel %vm904_vm2, %v396_v2, 0.0  ;;  %461 = vst [vmem:[#allocation2 + $0x8] sm:$0xcc] %v459_v60  ;;  %v819_v36 = vunpack.i.h.bf16 %v817_v57  ;;  %v284_v9 = vld [vmem:[#allocation2 + $0x20] sm:$0x33]  ;;  %v818_v13 = vunpack.i.l.bf16 %v817_v57 }
  0x96   :  { %426 = vst [vmem:[#allocation2] sm:$0xcc] %v424_v61  ;;  %v736_v12 = vpack.c.bf16 %v399_v8, %v398_v6  ;;  %v824_v16 = vunpack.i.h.bf16 %v822_v59  ;;  %v823_v17 = vunpack.i.l.bf16 %v822_v59  ;;  %v827_v19 = vpop.permute.xlu0 %826  ;;  %v832_v21 = vpop.permute.xlu1 %831  ;;  %443 = vst [vmem:[#allocation2 + $0x8] sm:$0x33] %v738_v5  ;;  %v703_v27 = vcombine.high %v284_v9, %v284_v9 }
  0x97   :  { %v829_v22 = vunpack.i.h.bf16 %v827_v19  ;;  %v828_v25 = vunpack.i.l.bf16 %v827_v19  ;;  %v837_v26 = vld [vmem:[#allocation2 + $0x14] ss:$8 sps:$4 sm:$0xff]   ;;  %v834_v18 = vunpack.i.h.bf16 %v832_v21  ;;  %vm1153_vm3 = vcmp.lt.s32.totalorder %v892_v10, 127 }
  0x98   :  { %408 = vst [vmem:[#allocation2] sm:$0x33] %v736_v12  ;;  %v476_v15 = vsel %vm1153_vm3, %v818_v13, %v819_v36  ;;  %vm1154_vm2 = vmmov %vm1153_vm3  ;;  %vm1155_vm4 = vcmp.lt.s32.totalorder %v892_v10, 112  ;;  %v283_v31 = vld [vmem:[#allocation2 + $0x18] sm:$0xff]  ;;  %323 = vmatprep.subr.bf16.mxu0 %v837_v26  ;;  %v833_v42 = vunpack.i.l.bf16 %v832_v21  ;;  %v702_v11 = vcombine.low %v284_v9, %v284_v9  ;;  %v279_v10 = vld [vmem:[%s1131_s1] sm:$0xf] }
  0x99   :  { %v477_v28 = vsel %vm1154_vm2, %v819_v36, %v818_v13  ;;  %v511_v29 = vsel %vm1155_vm4, %v823_v17, %v824_v16  ;;  %vm1156_vm5 = vmmov %vm1155_vm4  ;;  %712 = vst.sshfl [vmem:[#allocation2 + $0x10] sm:$0xf pattern:$0x76325410] %v889_v4  ;;  %v478_v32 = vsel %vm918_vm6, %v476_v15, 0.0  ;;  %v494_v35 = vsel %vm216_vm15, %v828_v25, %v829_v22 }
  0x9a   :  { %v512_v30 = vsel %vm1156_vm5, %v824_v16, %v823_v17  ;;  %v479_v33 = vsel %vm922_vm7, %v477_v28, 0.0  ;;  %v495_v39 = vsel %vm216_vm15, %v829_v22, %v828_v25  ;;  %v496_v4 = vsel %vm900_vm1, %v494_v35, 0.0 }
  0x9b   :  { %v514_v34 = vsel %vm79_vm11, %v512_v30, 0.0  ;;  %v740_v37 = vpack.c.bf16 %v479_v33, %v478_v32  ;;  %v497_v24 = vsel %vm1001_vm13, %v495_v39, 0.0  ;;  %v529_v46 = vsel %vm261_vm14, %v833_v42, %v834_v18 }
  0x9c   :  { %v742_v38 = vpack.c.bf16 %v514_v34, %v511_v29  ;;  %v741_v45 = vpack.c.bf16 %v497_v24, %v496_v4  ;;  %v530_v47 = vsel %vm261_vm14, %v834_v18, %v833_v42  ;;  %v531_v14 = vsel %vm918_vm6, %v529_v46, 0.0 }
  0x9d   :  { %v487_v43 = vrot.slane %v740_v37, 6  ;;  %v532_v20 = vsel %vm989_vm12, %v530_v47, 0.0  ;;  %v316_v48 = vsel %vm314_vm0, %v702_v11, 0  ;;  %vm310_vm1 = vcmask 293888  }
  0x9e   :  { %v522_v44 = vrot.slane %v742_v38, 6  ;;  %506 = vst [vmem:[#allocation2 + $0x18] sm:$0x33] %v741_v45  ;;  %v743_v49 = vpack.c.bf16 %v532_v20, %v531_v14  ;;  %vm60_vm6 = vcmask 7168   ;;  %v857_v57 = vmov 0.0  }
  0x9f   :  { %v840_v50 = vld [vmem:[#allocation2 + $0x4] ss:$8 sps:$4 sm:$0xff]   ;;  %v842_v51 = vld [vmem:[#allocation2] ss:$8 sps:$4 sm:$0xff]   ;;  %61 = vst.msk [vmem:[%s1132_s3] sm:$0xff] %vm60_vm6, %v857_v57  ;;  %62 = vst.msk [vmem:[%s1134_s4] sm:$0xff] %vm60_vm6, %v857_v57 }
  0xa0   :  { %v282_v40 = vld [vmem:[#allocation2 + $0x10] sm:$0xff]  ;;  %524 = vst [vmem:[#allocation2 + $0x18] sm:$0xcc] %v522_v44  ;;  %541 = vst [vmem:[#allocation2 + $0x20] sm:$0x33] %v743_v49  ;;  %582 = vmatprep.subr.bf16.mxu1 %v840_v50 }
  0xa1   :  { %v700_v41 = vcombine.low %v282_v40, %v283_v31  ;;  %489 = vst [vmem:[#allocation2 + $0x10] sm:$0xcc] %v487_v43  ;;  %583 = vmatpush1.bf16.msra.mxu1 %v842_v51 }
  0xa3   :  { %324 = vmatpush1.bf16.msra.mxu0 %v700_v41 }
  0xa4   :  { %704 = vmatprep.subr.msk.bf16.mxu0 %vm314_vm0, %v703_v27 }
  0xa6   :  { %v371_v17 = vld [vmem:[%s1132_s3] sm:$0xff] }
  0xa7   :  { %326 = vmatpush1.bf16.msra.mxu0 %v316_v48  ;;  %v547_v7 = vld [vmem:[#allocation2 + $0x20] sm:$0x33] }
  0xa8   :  { %v843_v23 = vld [vmem:[#allocation2 + $0x14] ss:$8 sps:$4 sm:$0xff]   ;;  %v845_v52 = vld [vmem:[#allocation2 + $0x10] ss:$8 sps:$4 sm:$0xff]   ;;  %v722_v53 = vcombine.high %v547_v7, %v547_v7  ;;  %v721_v54 = vcombine.low %v547_v7, %v547_v7  ;;  %v378_v21 = vld [vmem:[%s1134_s4] sm:$0xff] }
  0xa9   :  { %584 = vmatprep.subr.bf16.mxu1 %v843_v23 }
  0xaa   :  { %705 = vmatmul.mubr.msk.bf16.vlgmr.msra.gmra.mrb[0].mxu0 %vm310_vm1, %v279_v10  ;;  %585 = vmatpush1.bf16.msra.mxu1 %v845_v52  ;;  %v577_v55 = vsel %vm314_vm0, %v721_v54, 0 }
  0xab   :  { %723 = vmatprep.subr.msk.bf16.mxu1 %vm314_vm0, %v722_v53 }
  0xae   :  { %587 = vmatpush1.bf16.msra.mxu1 %v577_v55 }
  0xb1   :  { %724 = vmatmul.mubr.msk.bf16.vlgmr.msra.gmra.mrb[0].mxu1 %vm310_vm1, %v542_v56 }
 0x17d   :  { %v355_v58 = vpop.f32.mrb[0].mxu0 }
 0x17e   :  { %v357_v59 = vpop.f32.mrb[1].mxu0  ;;  %v379_v60 = vmul.f32 %v355_v58, %v355_v58 }
 0x17f   :  { %v735_v61 = vpack.c.bf16 %v357_v59, %v355_v58  ;;  %v359_v62 = vpop.f32.mrb[2].mxu0  ;;  %v372_v63 = vadd.f32 %v357_v59, %v355_v58  ;;  %v380_v0 = vmul.f32 %v357_v59, %v357_v59 }
 0x180   :  { %v360_v1 = vpop.f32.mrb[3].mxu0 }
 0x181   :  { %370 = vst [vmem:[%s1133_s2] sm:$0xff] %v735_v61  ;;  %373 = vadd.xlane.f32.xlu0 %v372_v63  ;;  %v381_v2 = vadd.f32 %v380_v0, %v379_v60 }
 0x183   :  { %382 = vadd.xlane.f32.xlu1 %v381_v2 }
 0x184   :  { %v616_v3 = vpop.f32.mrb[0].mxu1 }
 0x185   :  { %v618_v5 = vpop.f32.mrb[1].mxu1  ;;  %v640_v6 = vmul.f32 %v616_v3, %v616_v3 }
 0x186   :  { %v744_v8 = vpack.c.bf16 %v618_v5, %v616_v3  ;;  %v620_v36 = vpop.f32.mrb[2].mxu1  ;;  %v634_v9 = vadd.f32 %v618_v5, %v616_v3  ;;  %v641_v12 = vmul.f32 %v618_v5, %v618_v5 }
 0x187   :  { %v621_v13 = vpop.f32.mrb[3].mxu1 }
 0x188   :  { %726 = vst [vmem:[%s1133_s2 + $0x8] sm:$0xff] %v744_v8  ;;  %635 = vadd.xlane.f32.xlu0 %v634_v9  ;;  %v642_v16 = vadd.f32 %v641_v12, %v640_v6 }
 0x18c   :  { %643 = vadd.xlane.f32.xlu0 %v642_v16 }
 0x20e   :  { %v374_v19 = vpop.xlane.xlu0 %373 }
 0x20f   :  { %v375_v22 = vadd.f32 %v374_v19, %v371_v17 }
 0x210   :  { %v383_v25 = vpop.xlane.xlu1 %382 }
 0x211   :  { %377 = vst.msk [vmem:[%s1132_s3] sm:$0xff] %vm60_vm6, %v375_v22  ;;  %v384_v26 = vadd.f32 %v383_v25, %v378_v21 }
 0x213   :  { %385 = vst.msk [vmem:[%s1134_s4] sm:$0xff] %vm60_vm6, %v384_v26 }
 0x215   :  { %v636_v18 = vpop.xlane.xlu0 %635 }
 0x218   :  { %v633_v27 = vld [vmem:[%s1132_s3] sm:$0xff] }
 0x219   :  { %v637_v15 = vadd.f32 %v636_v18, %v633_v27  ;;  %v644_v29 = vpop.xlane.xlu0 %643 }
 0x21a   :  { %v639_v28 = vld [vmem:[%s1134_s4] sm:$0xff] }
 0x21b   :  { %638 = vst.msk [vmem:[%s1132_s3] sm:$0xff] %vm60_vm6, %v637_v15  ;;  %v645_v30 = vadd.f32 %v644_v29, %v639_v28 }
 0x21d   :  { %646 = vst.msk [vmem:[%s1134_s4] sm:$0xff] %vm60_vm6, %v645_v30 }

// kernel: vgg_block_forward.4
= control target key start
LH: loop header
LB: loop body
LE: loop exit
PB: predicated region body
PF: predicated region fallthrough
CT: control target
= control target key end

     0   :  { %v1039_v0 = vmov 0   ;;  %s1043_s15 = smov 16   ;;  %s1044_s16 = smov 1   ;;  %v89_v61 = vlaneseq  ;;  %vm1048_vm13 = vmmov 1   ;;  %s1410_s1 = inlined_call_operand.vmem [shape: f32[8,1], index: 1, kind: input, shape index: {}]   ;;  %s1411_s2 = inlined_call_operand.vmem [shape: f32[8,1], index: 2, kind: input, shape index: {}]   ;;  %s1412_s3 = inlined_call_operand.vmem [shape: f32[8,1], index: 3, kind: input, shape index: {}]   ;;  %s1413_s4 = inlined_call_operand.vmem [shape: f32[8,1], index: 4, kind: input, shape index: {}]   ;;  %s1414_s0 = inlined_call_operand.vmem [shape: bf16[2,8,256], index: 0, kind: input, shape index: {}]   ;;  %s1415_s5 = inlined_call_operand.vmem [shape: bf16[8,72], index: 5, kind: input, shape index: {}]   ;;  %s1416_s7 = inlined_call_operand.vmem [shape: f32[1,8,1], index: 7, kind: output, shape index: {1}]   ;;  %s1417_s6 = inlined_call_operand.vmem [shape: bf16[2,8,256], index: 6, kind: output, shape index: {0}]   ;;  %s1418_s8 = inlined_call_operand.vmem [shape: f32[1,8,1], index: 8, kind: output, shape index: {2}]  }
   0x1   :  { %948 = vset.pattern.permute.xlu0 %v1039_v0  ;;  %v75_v1 = vld [vmem:[%s1410_s1] sm:$0xff]  ;;  %426 = vmatprep.mubr.bf16.mxu0 %v1039_v0  ;;  %v823_v16 = vld [vmem:[%s1414_s0 + $0x8] sm:$0xff]  ;;  %s1045_s17 = smov 112   ;;  %s1046_s18 = smov 113  }
   0x2   :  { %v76_v2 = vld [vmem:[%s1411_s2] sm:$0xff]  ;;  %v79_v3 = vmul.f32 0.001953125, %v75_v1  ;;  %724 = vmatprep.mubr.bf16.mxu1 %v1039_v0  ;;  %v461_v19 = vunpack.c.l.bf16 %v823_v16  ;;  %v462_v20 = vunpack.c.h.bf16 %v823_v16  ;;  %s1047_s19 = smov 111   ;;  %v1125_v62 = vand.u32 127, %v89_v61 }
   0x3   :  { %v80_v4 = vmul.f32 0.001953125, %v76_v2  ;;  %v77_v9 = vld [vmem:[%s1412_s3] sm:$0xff]  ;;  %s1041_s3 = smov 17  }
   0x4   :  { %v81_v5 = vmul.f32 %v79_v3, %v79_v3  ;;  %v78_v12 = vld [vmem:[%s1413_s4] sm:$0xff]  ;;  %s1042_s4 = smov 127   ;;  %v1128_v63 = vadd.s32 128, %v1125_v62  ;;  %v92_v0 = vand.u32 15, %v1125_v62  ;;  %vm94_vm4 = vcmp.ge.s32.totalorder %v1125_v62, 16 }
   0x5   :  { %v110_v15 = vld [vmem:[%s1414_s0] sm:$0xff]  ;;  %s1040_s0 = smov 15   ;;  %vm147_vm6 = vcmp.lt.s32.totalorder %v1125_v62, 17  ;;  %vm1419_vm7 = vcmp.lt.s32.totalorder %v1125_v62, 15  ;;  %vm169_vm9 = vcmp.lt.s32.totalorder %v1125_v62, 16  ;;  %vm1421_vm10 = vcmp.lt.s32.totalorder %v1125_v62, 127 }
   0x6   :  { %v82_v6 = vsub.f32 %v80_v4, %v81_v5  ;;  %v111_v17 = vunpack.c.l.bf16 %v110_v15  ;;  %v112_v18 = vunpack.c.h.bf16 %v110_v15  ;;  %vm1133_vm5 = vcmp.ge.s32.totalorder %v92_v0, 1 }
   0x7   :  { %vm1149_vm11 = vmand %vm94_vm4, %vm1133_vm5  ;;  %vm1153_vm12 = vcmp.lt.s32.totalorder %v92_v0, 15  ;;  %vm213_vm15 = vcmp.lt.s32.totalorder %v1125_v62, 1 }
   0x8   :  { %v83_v7 = vmax.f32 %v82_v6, 0.0 }
   0xa   :  { %v84_v8 = vadd.f32 1e-05, %v83_v7 }
   0xc   :  { %1029 = vrsqrt.f32 %v84_v8 }
  0x16   :  { %v1030_v10 = vpop.eup %1029 }
  0x17   :  { %v86_v11 = vmul.f32 %v1030_v10, %v77_v9 }
  0x19   :  { %115 = vperm.xlu0 %948, %v86_v11   ;;  %v87_v13 = vmul.f32 %v86_v11, %v79_v3  ;;  %v93_v3 = vand.u32 15, %v1128_v63 }
  0x1b   :  { %v88_v14 = vsub.f32 %v78_v12, %v87_v13  ;;  %vm1139_vm8 = vcmp.ge.s32.totalorder %v93_v3, 1 }
  0x1c   :  { %vm1166_vm14 = vmpackc.low %vm1048_vm13, %vm1139_vm8 }
  0x1d   :  { %122 = vperm.xlu0 %948, %v88_v14  }
  0x98   :  { %v116_v21 = vpop.permute.xlu0 %115 }
  0x99   :  { %v118_v22 = vmul.f32 %v116_v21, %v111_v17  ;;  %v119_v23 = vmul.f32 %v116_v21, %v112_v18  ;;  %v463_v24 = vmul.f32 %v461_v19, %v116_v21  ;;  %v464_v25 = vmul.f32 %v462_v20, %v116_v21 }
  0x9c   :  { %v123_v26 = vpop.permute.xlu0 %122 }
  0x9d   :  { %v125_v27 = vadd.f32 %v123_v26, %v118_v22  ;;  %v126_v28 = vadd.f32 %v123_v26, %v119_v23  ;;  %v465_v29 = vadd.f32 %v463_v24, %v123_v26  ;;  %v466_v30 = vadd.f32 %v464_v25, %v123_v26 }
  0x9f   :  { %v127_v31 = vmin.f32 %v125_v27, 0.0  ;;  %v128_v32 = vmin.f32 %v126_v28, 0.0  ;;  %v467_v33 = vmin.f32 %v465_v29, 0.0  ;;  %v468_v34 = vmin.f32 %v466_v30, 0.0 }
  0xa0   :  { %vm137_vm0 = vcmp.gt.f32.partialorder %v125_v27, 0.0  ;;  %vm138_vm1 = vcmp.gt.f32.partialorder %v126_v28, 0.0  ;;  %vm477_vm2 = vcmp.gt.f32.partialorder %v465_v29, 0.0  ;;  %vm478_vm3 = vcmp.gt.f32.partialorder %v466_v30, 0.0 }
  0xa1   :  { %v129_v35 = vmul.f32 1.442695, %v127_v31  ;;  %v131_v36 = vmul.f32 1.442695, %v128_v32  ;;  %v469_v37 = vmul.f32 1.442695, %v467_v33 }
  0xa2   :  { %v471_v38 = vmul.f32 1.442695, %v468_v34 }
  0xa3   :  { %1031 = vpow2.f32 %v129_v35 }
  0xa4   :  { %1033 = vpow2.f32 %v131_v36 }
  0xa5   :  { %1035 = vpow2.f32 %v469_v37 }
  0xa6   :  { %1037 = vpow2.f32 %v471_v38 }
  0xad   :  { %v1032_v39 = vpop.eup %1031 }
  0xae   :  { %v1034_v40 = vpop.eup %1033  ;;  %v799_v41 = vadd.f32 -1.0, %v1032_v39 }
  0xaf   :  { %v1036_v42 = vpop.eup %1035  ;;  %v800_v43 = vadd.f32 -1.0, %v1034_v40 }
  0xb0   :  { %v1038_v44 = vpop.eup %1037  ;;  %v135_v45 = vmul.f32 1.6732632, %v799_v41  ;;  %v824_v46 = vadd.f32 -1.0, %v1036_v42 }
  0xb1   :  { %v136_v47 = vmul.f32 1.6732632, %v800_v43  ;;  %v825_v48 = vadd.f32 -1.0, %v1038_v44 }
  0xb2   :  { %v139_v49 = vsel %vm137_vm0, %v125_v27, %v135_v45  ;;  %v475_v52 = vmul.f32 1.6732632, %v824_v46  ;;  %vm1177_vm0 = vmpackc.low %vm94_vm4, %vm1149_vm11 }
  0xb3   :  { %v140_v50 = vsel %vm138_vm1, %v126_v28, %v136_v47  ;;  %v1113_v51 = vmul.f32 1.050701, %v139_v49  ;;  %v476_v53 = vmul.f32 1.6732632, %v825_v48  ;;  %vm1181_vm1 = vcmp.lt.s32.totalorder %v93_v3, 15 }
  0xb4   :  { %v1115_v54 = vmul.f32 1.050701, %v140_v50  ;;  %v479_v56 = vsel %vm477_vm2, %v465_v29, %v475_v52  ;;  %vm1189_vm2 = vmand %vm94_vm4, %vm1153_vm12 }
  0xb5   :  { %v480_v57 = vsel %vm478_vm3, %v466_v30, %v476_v53  ;;  %v1119_v58 = vmul.f32 1.050701, %v479_v56  ;;  %vm1420_vm3 = vmpackc.low %vm1139_vm8, %vm1181_vm1 }
  0xb6   :  { %v959_v55 = vpack.i.bf16 %v1115_v54, %v1113_v51  ;;  %v1121_v59 = vmul.f32 1.050701, %v480_v57  ;;  %vm1422_vm4 = vmpackc.low %vm1133_vm5, %vm1189_vm2 }
  0xb7   :  { %vm1218_vm11 = vmpackc.low %vm1181_vm1, %vm1048_vm13 }
  0xb8   :  { %960 = vrot.lane.b32.xlu0 %v959_v55, %s1040_s0  ;;  %950 = vrot.lane.b32.xlu1 %v959_v55, %s1041_s3  ;;  %v979_v60 = vpack.i.bf16 %v1121_v59, %v1119_v58 }
  0xbc   :  { %970 = vrot.lane.b32.xlu0 %v959_v55, %s1042_s4  ;;  %955 = vrot.lane.b32.xlu1 %v959_v55, %s1043_s15 }
  0xc0   :  { %980 = vrot.lane.b32.xlu0 %v979_v60, %s1043_s15  ;;  %965 = vrot.lane.b32.xlu1 %v959_v55, %s1044_s16 }
  0xc4   :  { %990 = vrot.lane.b32.xlu0 %v959_v55, %s1045_s17  ;;  %975 = vrot.lane.b32.xlu1 %v979_v60, %s1041_s3 }
  0xc8   :  { %1000 = vrot.lane.b32.xlu0 %v979_v60, %s1044_s16  ;;  %985 = vrot.lane.b32.xlu1 %v959_v55, %s1046_s18 }
  0xcc   :  { %1010 = vrot.lane.b32.xlu0 %v979_v60, %s1042_s4  ;;  %995 = vrot.lane.b32.xlu1 %v979_v60, %s1040_s0 }
  0xd0   :  { %1020 = vrot.lane.b32.xlu0 %v979_v60, %s1045_s17  ;;  %1005 = vrot.lane.b32.xlu1 %v959_v55, %s1047_s19 }
  0xd4   :  { %1015 = vrot.lane.b32.xlu1 %v979_v60, %s1046_s18 }
  0xd8   :  { %1025 = vrot.lane.b32.xlu1 %v979_v60, %s1047_s19 }
 0x12a   :  { %v961_v1 = vpop.permute.xlu0 %960  ;;  %v951_v2 = vpop.permute.xlu1 %950 }
 0x12b   :  { %v953_v4 = vunpack.i.h.bf16 %v951_v2  ;;  %v952_v5 = vunpack.i.l.bf16 %v951_v2  ;;  %v963_v14 = vunpack.i.h.bf16 %v961_v1  ;;  %v962_v15 = vunpack.i.l.bf16 %v961_v1 }
 0x12d   :  { %v148_v16 = vsel %vm147_vm6, %v952_v5, %v953_v4  ;;  %v149_v17 = vsel %vm147_vm6, %v953_v4, %v952_v5  ;;  %v192_v32 = vsel %vm1419_vm7, %v962_v15, %v963_v14  ;;  %v193_v35 = vsel %vm1419_vm7, %v963_v14, %v962_v15 }
 0x12e   :  { %v971_v7 = vpop.permute.xlu0 %970  ;;  %v956_v8 = vpop.permute.xlu1 %955  ;;  %vm105_vm7 = vcmp.lt.s32.totalorder %v1128_v63, 240 }
 0x12f   :  { %v958_v10 = vunpack.i.h.bf16 %v956_v8  ;;  %v957_v11 = vunpack.i.l.bf16 %v956_v8  ;;  %v973_v18 = vunpack.i.h.bf16 %v971_v7  ;;  %v972_v19 = vunpack.i.l.bf16 %v971_v7 }
 0x131   :  { %v170_v20 = vsel %vm169_vm9, %v957_v11, %v958_v10  ;;  %v171_v22 = vsel %vm169_vm9, %v958_v10, %v957_v11  ;;  %v246_v36 = vsel %vm1421_vm10, %v973_v18, %v972_v19  ;;  %v245_v46 = vsel %vm1421_vm10, %v972_v19, %v973_v18 }
 0x132   :  { %v981_v23 = vpop.permute.xlu0 %980  ;;  %v966_v24 = vpop.permute.xlu1 %965  ;;  %v880_v25 = vpack.c.bf16 %v170_v20, %v148_v16  ;;  %v883_v27 = vpack.c.bf16 %v171_v22, %v149_v17  ;;  %v892_v47 = vpack.c.bf16 %v246_v36, %v1115_v54  ;;  %vm1423_vm10 = vcmp.lt.s32.totalorder %v1125_v62, 113 }
 0x133   :  { %v968_v29 = vunpack.i.h.bf16 %v966_v24  ;;  %v967_v30 = vunpack.i.l.bf16 %v966_v24  ;;  %v983_v33 = vunpack.i.h.bf16 %v981_v23  ;;  %v982_v34 = vunpack.i.l.bf16 %v981_v23 }
 0x134   :  { %881 = vmatprep.subr.msk.bf16.mxu0 %vm1166_vm14, %v880_v25  ;;  %v895_v0 = vpack.c.bf16 %v245_v46, %v1113_v51 }
 0x135   :  { %v214_v37 = vsel %vm213_vm15, %v967_v30, %v968_v29  ;;  %v215_v38 = vsel %vm213_vm15, %v968_v29, %v967_v30  ;;  %884 = vmatpush1.bf16.msk.msra.mxu0 %vm1177_vm0, %v883_v27  ;;  %v504_v48 = vsel %vm169_vm9, %v982_v34, %v983_v33  ;;  %v505_v49 = vsel %vm169_vm9, %v983_v33, %v982_v34 }
 0x136   :  { %v886_v39 = vpack.c.bf16 %v214_v37, %v192_v32  ;;  %v889_v40 = vpack.c.bf16 %v215_v38, %v193_v35  ;;  %v991_v41 = vpop.permute.xlu0 %990  ;;  %v976_v42 = vpop.permute.xlu1 %975  ;;  %vm288_vm9 = vcmp.lt.s32.totalorder %v1125_v62, 112 }
 0x137   :  { %v978_v43 = vunpack.i.h.bf16 %v976_v42  ;;  %v977_v44 = vunpack.i.l.bf16 %v976_v42  ;;  %v993_v50 = vunpack.i.h.bf16 %v991_v41  ;;  %v992_v52 = vunpack.i.l.bf16 %v991_v41 }
 0x138   :  { %887 = vmatprep.subr.msk.bf16.mxu0 %vm1420_vm3, %v886_v39  ;;  %vm1245_vm3 = vmpackc.low %vm1153_vm12, %vm1048_vm13 }
 0x139   :  { %890 = vmatpush1.bf16.msk.msra.mxu0 %vm1422_vm4, %v889_v40  ;;  %v487_v53 = vsel %vm147_vm6, %v977_v44, %v978_v43  ;;  %v488_v55 = vsel %vm147_vm6, %v978_v43, %v977_v44  ;;  %vm107_vm4 = vmand %vm105_vm7, %vm1139_vm8  ;;  %v289_v5 = vsel %vm288_vm9, %v992_v52, %v993_v50  ;;  %v290_v7 = vsel %vm288_vm9, %v993_v50, %v992_v52  ;;  %v328_v50 = vld [vmem:[%s1415_s5] sm:$0xf] }
 0x13a   :  { %v1001_v56 = vpop.permute.xlu0 %1000  ;;  %v986_v57 = vpop.permute.xlu1 %985  ;;  %893 = vmatprep.subr.msk.bf16.mxu0 %vm1218_vm11, %v892_v47  ;;  %v914_v60 = vpack.c.bf16 %v504_v48, %v487_v53  ;;  %v917_v61 = vpack.c.bf16 %v505_v49, %v488_v55  ;;  %vm1274_vm6 = vmpackc.low %vm105_vm7, %vm107_vm4 }
 0x13b   :  { %v988_v1 = vunpack.i.h.bf16 %v986_v57  ;;  %v987_v2 = vunpack.i.l.bf16 %v986_v57  ;;  %v1003_v3 = vunpack.i.h.bf16 %v1001_v56  ;;  %v1002_v4 = vunpack.i.l.bf16 %v1001_v56 }
 0x13c   :  { %915 = vmatprep.subr.msk.bf16.mxu1 %vm1166_vm14, %v914_v60  ;;  %vm1283_vm14 = vmpackc.low %vm1048_vm13, %vm1133_vm5  ;;  %vm1449_vm13 = vcmp.lt.s32.totalorder %v1125_v62, 15 }
 0x13d   :  { %v267_v8 = vsel %vm1423_vm10, %v987_v2, %v988_v1  ;;  %v268_v10 = vsel %vm1423_vm10, %v988_v1, %v987_v2  ;;  %896 = vmatpush1.bf16.msk.msra.mxu0 %vm1245_vm3, %v895_v0  ;;  %918 = vmatpush1.bf16.msk.msra.mxu1 %vm1177_vm0, %v917_v61  ;;  %v538_v21 = vsel %vm213_vm15, %v1002_v4, %v1003_v3  ;;  %vm1448_vm0 = vcmp.lt.s32.totalorder %v1125_v62, 127  ;;  %vm1450_vm4 = vmmov %vm1449_vm13  ;;  %v628_v1 = vld [vmem:[%s1415_s5] sm:$0xf] }
 0x13e   :  { %v898_v11 = vpack.c.bf16 %v290_v7, %v268_v10  ;;  %v901_v12 = vpack.c.bf16 %v289_v5, %v267_v8  ;;  %v1011_v14 = vpop.permute.xlu0 %1010  ;;  %v996_v15 = vpop.permute.xlu1 %995  ;;  %v539_v22 = vsel %vm213_vm15, %v1003_v3, %v1002_v4  ;;  %vm310_vm10 = vcmp.lt.s32.totalorder %v1125_v62, 111  ;;  %vm1451_vm15 = vmmov %vm1448_vm0 }
 0x13f   :  { %v1013_v17 = vunpack.i.h.bf16 %v1011_v14  ;;  %v1012_v18 = vunpack.i.l.bf16 %v1011_v14  ;;  %v998_v19 = vunpack.i.h.bf16 %v996_v15  ;;  %v997_v20 = vunpack.i.l.bf16 %v996_v15 }
 0x140   :  { %899 = vmatprep.subr.msk.bf16.mxu0 %vm1274_vm6, %v898_v11 }
 0x141   :  { %v565_v23 = vsel %vm1448_vm0, %v1013_v17, %v1012_v18  ;;  %v521_v24 = vsel %vm1449_vm13, %v997_v20, %v998_v19  ;;  %v522_v25 = vsel %vm1450_vm4, %v998_v19, %v997_v20  ;;  %902 = vmatpush1.bf16.msk.msra.mxu0 %vm1283_vm14, %v901_v12  ;;  %v564_v32 = vsel %vm1451_vm15, %v1012_v18, %v1013_v17  ;;  %vm1308_vm0 = vmand %vm105_vm7, %vm1181_vm1 }
 0x142   :  { %v920_v26 = vpack.c.bf16 %v538_v21, %v521_v24  ;;  %v923_v27 = vpack.c.bf16 %v539_v22, %v522_v25  ;;  %v1021_v29 = vpop.permute.xlu0 %1020  ;;  %v1006_v30 = vpop.permute.xlu1 %1005  ;;  %v926_v36 = vpack.c.bf16 %v565_v23, %v1121_v59  ;;  %vm1454_vm13 = vmpackc.low %vm1139_vm8, %vm1181_vm1  ;;  %v929_v63 = vpack.c.bf16 %v564_v32, %v1119_v58 }
 0x143   :  { %v1008_v34 = vunpack.i.h.bf16 %v1006_v30  ;;  %v1007_v35 = vunpack.i.l.bf16 %v1006_v30  ;;  %v1023_v37 = vunpack.i.h.bf16 %v1021_v29  ;;  %v1022_v38 = vunpack.i.l.bf16 %v1021_v29  ;;  %vm1455_vm7 = vmpackc.low %vm1133_vm5, %vm1189_vm2 }
 0x144   :  { %921 = vmatprep.subr.msk.bf16.mxu1 %vm1454_vm13, %v920_v26  ;;  %vm387_vm8 = vcmask 1043456   ;;  %vm1456_vm5 = vcmp.lt.s32.totalorder %v1125_v62, 113  ;;  %vm383_vm2 = vcmask 588800   ;;  %v1049_v62 = vmov 0.0  }
 0x145   :  { %v312_v39 = vsel %vm310_vm10, %v1008_v34, %v1007_v35  ;;  %924 = vmatpush1.bf16.msk.msra.mxu1 %vm1455_vm7, %v923_v27  ;;  %v311_v59 = vsel %vm310_vm10, %v1007_v35, %v1008_v34  ;;  %v598_v43 = vsel %vm288_vm9, %v1022_v38, %v1023_v37  ;;  %v599_v58 = vsel %vm288_vm9, %v1023_v37, %v1022_v38  ;;  %vm1457_vm1 = vmmov %vm1456_vm5 }
 0x146   :  { %v318_v9 = vsel %vm1308_vm0, %v312_v39, 0.0  ;;  %v1016_v28 = vpop.permute.xlu1 %1015  ;;  %927 = vmatprep.subr.msk.bf16.mxu1 %vm1218_vm11, %v926_v36  ;;  %v317_v6 = vsel %vm1153_vm12, %v311_v59, 0.0 }
 0x147   :  { %v1018_v40 = vunpack.i.h.bf16 %v1016_v28  ;;  %v1017_v31 = vunpack.i.l.bf16 %v1016_v28  ;;  %v878_v41 = vpack.c.bf16 %v318_v9, %v318_v9  ;;  %v877_v42 = vpack.c.bf16 %v317_v6, %v317_v6 }
 0x149   :  { %v581_v44 = vsel %vm1456_vm5, %v1017_v31, %v1018_v40  ;;  %v582_v45 = vsel %vm1457_vm1, %v1018_v40, %v1017_v31  ;;  %820 = vmatprep.subr.msk.bf16.mxu0 %vm387_vm8, %v878_v41  ;;  %930 = vmatpush1.bf16.msk.msra.mxu1 %vm1245_vm3, %v929_v63  ;;  %v389_v46 = vsel %vm387_vm8, %v877_v42, 0 }
 0x14a   :  { %v932_v47 = vpack.c.bf16 %v599_v58, %v582_v45  ;;  %v935_v48 = vpack.c.bf16 %v598_v43, %v581_v44  ;;  %v1026_v49 = vpop.permute.xlu1 %1025  ;;  %403 = vmatpush1.bf16.msra.mxu0 %v389_v46 }
 0x14b   :  { %v1028_v52 = vunpack.i.h.bf16 %v1026_v49  ;;  %v1027_v53 = vunpack.i.l.bf16 %v1026_v49 }
 0x14c   :  { %933 = vmatprep.subr.msk.bf16.mxu1 %vm1274_vm6, %v932_v47 }
 0x14d   :  { %v616_v54 = vsel %vm310_vm10, %v1028_v52, %v1027_v53  ;;  %821 = vmatmul.mubr.msk.bf16.vlgmr.msra.gmra.mrb[0].mxu0 %vm383_vm2, %v328_v50  ;;  %936 = vmatpush1.bf16.msk.msra.mxu1 %vm1283_vm14, %v935_v48  ;;  %v615_v55 = vsel %vm310_vm10, %v1027_v53, %v1028_v52  ;;  %vm72_vm10 = vcmask 7168  }
 0x14e   :  { %v618_v56 = vsel %vm1308_vm0, %v616_v54, 0.0  ;;  %v617_v57 = vsel %vm1153_vm12, %v615_v55, 0.0  ;;  %73 = vst.msk [vmem:[%s1416_s7] sm:$0xff] %vm72_vm10, %v1049_v62  ;;  %74 = vst.msk [vmem:[%s1418_s8] sm:$0xff] %vm72_vm10, %v1049_v62 }
 0x14f   :  { %v912_v60 = vpack.c.bf16 %v618_v56, %v618_v56  ;;  %v911_v61 = vpack.c.bf16 %v617_v57, %v617_v57 }
 0x151   :  { %845 = vmatprep.subr.msk.bf16.mxu1 %vm387_vm8, %v912_v60  ;;  %v687_v0 = vsel %vm387_vm8, %v911_v61, 0 }
 0x152   :  { %701 = vmatpush1.bf16.msra.mxu1 %v687_v0 }
 0x155   :  { %846 = vmatmul.mubr.msk.bf16.vlgmr.msra.gmra.mrb[0].mxu1 %vm383_vm2, %v628_v1  ;;  %v444_v21 = vld [vmem:[%s1416_s7] sm:$0xff] }
 0x156   :  { %v451_v23 = vld [vmem:[%s1418_s8] sm:$0xff] }
 0x220   :  { %v428_v13 = vpop.f32.mrb[0].mxu0 }
 0x221   :  { %v430_v2 = vpop.f32.mrb[1].mxu0  ;;  %v452_v3 = vmul.f32 %v428_v13, %v428_v13 }
 0x222   :  { %v858_v4 = vpack.c.bf16 %v430_v2, %v428_v13  ;;  %v432_v5 = vpop.f32.mrb[2].mxu0  ;;  %v445_v7 = vadd.f32 %v430_v2, %v428_v13  ;;  %v453_v8 = vmul.f32 %v430_v2, %v430_v2 }
 0x223   :  { %v433_v10 = vpop.f32.mrb[3].mxu0 }
 0x224   :  { %443 = vst [vmem:[%s1417_s6] sm:$0xff] %v858_v4  ;;  %446 = vadd.xlane.f32.xlu0 %v445_v7  ;;  %v454_v51 = vadd.f32 %v453_v8, %v452_v3 }
 0x226   :  { %455 = vadd.xlane.f32.xlu1 %v454_v51 }
 0x228   :  { %v726_v11 = vpop.f32.mrb[0].mxu1 }
 0x229   :  { %v728_v12 = vpop.f32.mrb[1].mxu1  ;;  %v750_v14 = vmul.f32 %v726_v11, %v726_v11 }
 0x22a   :  { %v868_v15 = vpack.c.bf16 %v728_v12, %v726_v11  ;;  %v730_v16 = vpop.f32.mrb[2].mxu1  ;;  %v744_v17 = vadd.f32 %v728_v12, %v726_v11  ;;  %v751_v18 = vmul.f32 %v728_v12, %v728_v12 }
 0x22b   :  { %v731_v19 = vpop.f32.mrb[3].mxu1 }
 0x22c   :  { %848 = vst [vmem:[%s1417_s6 + $0x8] sm:$0xff] %v868_v15  ;;  %745 = vadd.xlane.f32.xlu0 %v744_v17  ;;  %v752_v20 = vadd.f32 %v751_v18, %v750_v14 }
 0x230   :  { %753 = vadd.xlane.f32.xlu0 %v752_v20 }
 0x2b1   :  { %v447_v22 = vpop.xlane.xlu0 %446 }
 0x2b2   :  { %v448_v24 = vadd.f32 %v447_v22, %v444_v21 }
 0x2b3   :  { %v456_v25 = vpop.xlane.xlu1 %455 }
 0x2b4   :  { %450 = vst.msk [vmem:[%s1416_s7] sm:$0xff] %vm72_vm10, %v448_v24  ;;  %v457_v26 = vadd.f32 %v456_v25, %v451_v23 }
 0x2b6   :  { %458 = vst.msk [vmem:[%s1418_s8] sm:$0xff] %vm72_vm10, %v457_v26 }
 0x2b9   :  { %v746_v27 = vpop.xlane.xlu0 %745 }
 0x2bb   :  { %v743_v29 = vld [vmem:[%s1416_s7] sm:$0xff] }
 0x2bc   :  { %v747_v30 = vadd.f32 %v746_v27, %v743_v29 }
 0x2bd   :  { %v749_v32 = vld [vmem:[%s1418_s8] sm:$0xff]  ;;  %v754_v33 = vpop.xlane.xlu0 %753 }
 0x2be   :  { %748 = vst.msk [vmem:[%s1416_s7] sm:$0xff] %vm72_vm10, %v747_v30  ;;  %v755_v34 = vadd.f32 %v754_v33, %v749_v32 }
 0x2c0   :  { %756 = vst.msk [vmem:[%s1418_s8] sm:$0xff] %vm72_vm10, %v755_v34 }

</bundles_post_ra>
